<compile_context>
chip_gen: v7x
topology: tpu7x:2x2x1
jax: 0.10.0
libtpu: 0.0.40
codegen_flags: <defaults>
</compile_context>

<pallas_src>
import jax
import jax.numpy as jnp
from jax.experimental import pallas as pl
from jax.experimental.pallas import tpu as pltpu

IN_FEATURES = 588       # 3 * 14 * 14
OUT_FEATURES = 1152
TM_TARGET = 512         # ~85% of HBM roofline per tiled-copy measurements


def _linear_kernel(x_ref, w_ref, b_ref, o_ref):
    # x_ref: (TM, 588) f32    w_ref: (588, 1152) bf16
    # b_ref: (1, 1152) f32    o_ref: (TM, 1152)  bf16
    x_bf16 = x_ref[...].astype(jnp.bfloat16)          # in-kernel VPU cast
    acc = jnp.dot(x_bf16, w_ref[...], preferred_element_type=jnp.float32)
    o_ref[...] = (acc + b_ref[...]).astype(o_ref.dtype)


def _choose_tm(m, target=TM_TARGET):
    """8-aligned row tile; >= 2 grid steps whenever m > 8, ~target rows/tile."""
    m_pad = ((m + 7) // 8) * 8
    if m_pad <= 8:
        return 8
    n_steps = max(2, (m + target - 1) // target)
    tm = (m + n_steps - 1) // n_steps
    tm = ((tm + 7) // 8) * 8
    return min(tm, m_pad)


def prepare_linear_params(weight, bias):
    """One-time (load-time) prep: pre-transposed bf16 weight, 2-D f32 bias."""
    assert weight.shape == (OUT_FEATURES, IN_FEATURES)
    w_t = weight.T.astype(jnp.bfloat16)                       # (588, 1152)
    b2d = bias.astype(jnp.float32).reshape(1, OUT_FEATURES)   # (1, 1152)
    return w_t, b2d


def linear_patch_embedding(x, w_t, b2d):
    """x: (B, S, 588) f32; w_t: (588, 1152) bf16; b2d: (1, 1152) f32 -> bf16."""
    B, S, K = x.shape
    assert K == IN_FEATURES and w_t.shape == (IN_FEATURES, OUT_FEATURES)
    N = OUT_FEATURES
    M = B * S

    x2d = x.reshape(M, K)                 # no dtype cast here (done in-kernel)
    TM = _choose_tm(M)
    grid = (pl.cdiv(M, TM),)

    cost = pl.CostEstimate(
        flops=2 * M * K * N,
        transcendentals=0,
        bytes_accessed=(M * K * 4) + (K * N * 2) + (N * 4) + (M * N * 2),
    )

    out = pl.pallas_call(
        _linear_kernel,
        out_shape=jax.ShapeDtypeStruct((M, N), jnp.bfloat16),
        grid_spec=pltpu.PrefetchScalarGridSpec(
            num_scalar_prefetch=0,
            grid=grid,
            in_specs=[
                # x row tile: streamed (double-buffered by default).
                pl.BlockSpec((TM, K), lambda i: (i, 0)),
                # W^T and bias: grid-invariant -> resident, single-buffered.
                pl.BlockSpec((K, N), lambda i: (0, 0),
                             pipeline_mode=pl.Buffered(1)),
                pl.BlockSpec((1, N), lambda i: (0, 0),
                             pipeline_mode=pl.Buffered(1)),
            ],
            out_specs=pl.BlockSpec((TM, N), lambda i: (i, 0)),  # lane-dense slab
        ),
        compiler_params=pltpu.CompilerParams(
            dimension_semantics=("parallel",),   # M axis shards across TCs
        ),
        cost_estimate=cost,
    )(x2d, w_t, b2d)

    return out.reshape(B, S, N)


if __name__ == "__main__":
    key = jax.random.PRNGKey(0)
    k_x, k_w, k_b = jax.random.split(key, 3)

    # Small-but-consistent shapes: batch=2, seq (num patches)=8, features=588.
    B, S = 2, 8
    x = jax.random.normal(k_x, (B, S, IN_FEATURES), dtype=jnp.float32)

    # Deterministic nn.Linear-style init: U(-1/sqrt(in), 1/sqrt(in)).
    bound = 1.0 / (IN_FEATURES ** 0.5)
    weight = jax.random.uniform(
        k_w, (OUT_FEATURES, IN_FEATURES), minval=-bound, maxval=bound,
        dtype=jnp.float32)
    bias = jax.random.uniform(
        k_b, (OUT_FEATURES,), minval=-bound, maxval=bound, dtype=jnp.float32)

    # Load-time prep (hoisted weight transpose + cast).
    w_t, b2d = prepare_linear_params(weight, bias)

    y = linear_patch_embedding(x, w_t, b2d)
    y = jax.block_until_ready(y)
    assert y.shape == (B, S, OUT_FEATURES)
    assert y.dtype == jnp.bfloat16
    y_f32 = y.astype(jnp.float32)

    # Check against a reference with matching numerics:
    # bf16 operands, f32 accumulation + bias, bf16 output.
    y_ref_bf16 = (
        jnp.dot(
            x.reshape(-1, IN_FEATURES).astype(jnp.bfloat16),
            weight.T.astype(jnp.bfloat16),
            preferred_element_type=jnp.float32,
        )
        + bias
    ).astype(jnp.bfloat16).astype(jnp.float32).reshape(B, S, OUT_FEATURES)
    assert jnp.allclose(y_f32, y_ref_bf16, atol=2e-2, rtol=2e-2)

    # Loose check against the full-f32 PyTorch-equivalent reference.
    # Intentional numerics choice: bf16 operands + bf16 output (~1e-2 rel),
    # accumulation stays f32.
    y_ref_f32 = x @ weight.T + bias
    assert jnp.allclose(y_f32, y_ref_f32, atol=6e-2, rtol=6e-2)

    print("KERNEL_OK")
</pallas_src>

<mosaic_0001>
module attributes {stable_mosaic.version = 11 : i64} {
  func.func @_linear_kernel(%arg0: i32, %arg1: memref<8x588xf32, #tpu.memory_space<vmem>>, %arg2: memref<588x1152xbf16, #tpu.memory_space<vmem>>, %arg3: memref<1x1152xf32, #tpu.memory_space<vmem>>, %arg4: memref<8x1152xbf16, #tpu.memory_space<vmem>>) attributes {dimension_semantics = [#tpu.dimension_semantics<parallel>], iteration_bounds = array<i64: 2>, scalar_prefetch = 0 : i64, scratch_operands = 0 : i64, tpu.core_type = #tpu.core_type<tc>, window_params = [{transform_indices = @transform_0, window_bounds = array<i64: 8, 588>}, {pipeline_mode = #tpu.pipeline_mode<synchronous>, transform_indices = @transform_1, window_bounds = array<i64: 588, 1152>}, {pipeline_mode = #tpu.pipeline_mode<synchronous>, transform_indices = @transform_2, window_bounds = array<i64: 1, 1152>}, {transform_indices = @transform_3, window_bounds = array<i64: 8, 1152>}]} {
    %c0 = arith.constant 0 : index
    %c0_0 = arith.constant 0 : index
    %0 = vector.load %arg1[%c0, %c0_0] : memref<8x588xf32, #tpu.memory_space<vmem>>, vector<8x588xf32>
    %1 = arith.truncf %0 : vector<8x588xf32> to vector<8x588xbf16>
    %c0_1 = arith.constant 0 : index
    %c0_2 = arith.constant 0 : index
    %2 = vector.load %arg2[%c0_1, %c0_2] : memref<588x1152xbf16, #tpu.memory_space<vmem>>, vector<588x1152xbf16>
    %cst = arith.constant dense<0.000000e+00> : vector<8x1152xf32>
    %3 = tpu.matmul %1, %2, %cst {dimension_numbers = #tpu.dot_dimension_numbers<[1], [0], [0], [1], [0, 0, 1, 1], [], []>} : vector<8x588xbf16>, vector<588x1152xbf16>, vector<8x1152xf32> -> vector<8x1152xf32>
    %c0_3 = arith.constant 0 : index
    %c0_4 = arith.constant 0 : index
    %4 = vector.load %arg3[%c0_3, %c0_4] : memref<1x1152xf32, #tpu.memory_space<vmem>>, vector<1x1152xf32>
    %5 = vector.broadcast %4 : vector<1x1152xf32> to vector<8x1152xf32>
    %6 = arith.addf %3, %5 : vector<8x1152xf32>
    %7 = arith.truncf %6 : vector<8x1152xf32> to vector<8x1152xbf16>
    %c0_5 = arith.constant 0 : index
    %c0_6 = arith.constant 0 : index
    %8 = vector.load %arg4[%c0_5, %c0_6] : memref<8x1152xbf16, #tpu.memory_space<vmem>>, vector<8x1152xbf16>
    tpu.vector_store %arg4[%c0_5, %c0_6], %7 {strides = array<i32>} : memref<8x1152xbf16, #tpu.memory_space<vmem>>, vector<8x1152xbf16>,
    return
  }
  func.func @transform_0(%arg0: i32) -> (i32, i32) {
    %c0_i32 = arith.constant 0 : i32
    %c0_i32_0 = arith.constant 0 : i32
    return %arg0, %c0_i32 : i32, i32
  }
  func.func @transform_1(%arg0: i32) -> (i32, i32) {
    %c0_i32 = arith.constant 0 : i32
    %c0_i32_0 = arith.constant 0 : i32
    %c0_i32_1 = arith.constant 0 : i32
    return %c0_i32, %c0_i32_0 : i32, i32
  }
  func.func @transform_2(%arg0: i32) -> (i32, i32) {
    %c0_i32 = arith.constant 0 : i32
    %c0_i32_0 = arith.constant 0 : i32
    %c0_i32_1 = arith.constant 0 : i32
    return %c0_i32, %c0_i32_0 : i32, i32
  }
  func.func @transform_3(%arg0: i32) -> (i32, i32) {
    %c0_i32 = arith.constant 0 : i32
    %c0_i32_0 = arith.constant 0 : i32
    return %arg0, %c0_i32 : i32, i32
  }
}

</mosaic_0001>

<bundles_post_ra>
// kernel: tpu_custom_call.1
= control target key start
LH: loop header
LB: loop body
LE: loop exit
PB: predicated region body
PF: predicated region fallthrough
CT: control target
= control target key end

     0   :  { %8 = vsyncpa [#allocation3], 0  ;;  %s4640_s0 = inlined_call_operand.hbm [shape: f32[16,588], index: 0, kind: input, shape index: {}]   ;;  %s4641_s1 = inlined_call_operand.hbm [shape: bf16[588,1152], index: 1, kind: input, shape index: {}]   ;;  %s4642_s2 = inlined_call_operand.hbm [shape: f32[1,1152], index: 2, kind: input, shape index: {}]   ;;  %s4643_s3 = inlined_call_operand.hbm [shape: bf16[16,1152], index: 3, kind: output, shape index: {}]  }
   0x1   :  { %10 = vsyncpa [#allocation3 + $0x1], 0 }
   0x2   :  { %11 = vsyncpa [#allocation6], 0 }
   0x3   :  { %12 = vsyncpa [#allocation4], 0 }
   0x4   :  { %14 = vsyncpa [#allocation4 + $0x1], 0  ;;  %s4341_s12 = smov 0   ;;  %s4343_s13 = smov 0  }
   0x5   :  { %s4345_s14 = smov 0   ;;  %s4347_s15 = smov 0  }
   0x6 LB: > { %s4362_s16 = sadd.s32 4294967295, %s4310_s15   ;;  %s3127_s17 = sadd.s32 4294967294, %s4310_s15   ;;  %s4310_s15 = sphi %s4347_s15, %s4663_s15   ;;  %s4306_s14 = sphi %s4345_s14, %s4662_s14   ;;  %s4302_s13 = sphi %s4343_s13, %s4661_s13   ;;  %s4298_s12 = sphi %s4341_s12, %s4660_s12  }
   0x7   : > { %p40_p0 = scmp.ne.s32.totalorder %s4302_s13, %s4298_s12  ;;  %p4644_p1 = scmp.eq.s32.totalorder %s4362_s16, 0 }
   0x8   : > { %p112_p3 = scmp.eq.s32.totalorder %s3127_s17, 1  ;;  %p3128_p5 = scmp.ge.s32.totalorder %s4310_s15, 1 }
   0x9   : > { %p4371_p4 = por %p4644_p1, %p40_p0  ;;  %p119_p7 = scmp.lt.s32.totalorder %s4310_s15, 3 }
   0xa   : > { %p4376_p6 = por %p112_p3, %p40_p0  ;;  %s4312_s21 = smov [#allocation5]  }
   0xb   : > { %s4647_s18 = scalar_select %p4371_p4, 1, 0 }
   0xc   : > { %s4648_s19 = scalar_select %p4376_p6, 1, 0 }
   0xd   : > { %p4381_p8 = pnand %p3128_p5, %p119_p7  ;;  %s131_s22 = sshll.u32 %s4312_s21, 4  ;;  %s4385_s22 = int_to_ptr.vmem [resolvable:$true] %s131_s22 }
   0xe   : > { %s4313_s24 = smov [#allocation7]   ;;  %s4154_s28 = scalar_lea.hbm %s4641_s1, 42624 }
   0xf   : > { %p3613_p9 = pneg %p4381_p8  ;;  %s145_s25 = sshll.u32 %s4313_s24, 4  ;;  %s4396_s25 = int_to_ptr.vmem [resolvable:$true] %s145_s25 }
  0x10   : > { %p4155_p12 = scmp.ne.s32.totalorder %s4641_s1, %s4154_s28  ;;  %p4161_p5 = scmp.lt.u32.totalorder %s4154_s28, %s4641_s1 }
  0x11   : > { %p4392_p11 = pnand %p3613_p9, %p4644_p1 }
  0x13   : > { %p4156_p13 = pneg %p4392_p11 }
  0x15   : > { %p4157_p0 = pnand %p4156_p13, %p4155_p12 }
  0x17   : > { %p4158_p3 = pneg %p4157_p0 }
  0x19   : > { %p4163_p7 = pnand %p4161_p5, %p4158_p3 }
  0x1b   : > { %4166 = shalt.err (!%p4163_p7)
}
  0x1c   : > { %s4167_s6 = scalar_lea.vmem %s4385_s22, 42624  ;;  %p4175_p2 = scmp.lt.s32.totalorder %s4385_s22, %s4385_s22 }
  0x1d   : > { %p4168_p9 = scmp.ne.s32.totalorder %s4385_s22, %s4167_s6  ;;  %p4176_p12 = scmp.lt.s32.totalorder %s4167_s6, %s4167_s6 }
  0x1f   : > { %p4170_p10 = pnand %p4168_p9, %p4156_p13  ;;  %p4177_p0 = por %p4176_p12, %p4175_p2 }
  0x21   : > { %p4171_p1 = pneg %p4170_p10 }
  0x23   : > { %p4178_p6 = pnand %p4177_p0, %p4171_p1 }
  0x25   : > { %4181 = shalt.err (!%p4178_p6)
}
  0x26   : > { %s4314_s7 = smov 576   ;;  %s4315_s8 = smov 36  }
  0x27   : > { %3616 = dma.hbm_to_vmem [thread:$0]  (!%p4392_p11), %s4641_s1, 42624, %s4385_s22, [#allocation6], %s4314_s7, %s4314_s7, %s4315_s8  }
  0x28   : > { %s4182_s21 = scalar_lea.hbm %s4642_s2, 144 }
  0x29   : > { %p4183_p2 = scmp.ne.s32.totalorder %s4642_s2, %s4182_s21  ;;  %p4189_p10 = scmp.lt.u32.totalorder %s4182_s21, %s4642_s2 }
  0x2b   : > { %p4185_p1 = pnand %p4183_p2, %p4156_p13 }
  0x2d   : > { %p4186_p6 = pneg %p4185_p1 }
  0x2f   : > { %p4191_p3 = pnand %p4189_p10, %p4186_p6 }
  0x31   : > { %4194 = shalt.err (!%p4191_p3)
}
  0x32   : > { %s4195_s22 = scalar_lea.vmem %s4396_s25, 144  ;;  %s4202_s29 = scalar_lea.vmem %s4396_s25, 160 }
  0x33   : > { %p4196_p5 = scmp.ne.s32.totalorder %s4396_s25, %s4195_s22  ;;  %p4203_p12 = scmp.lt.s32.totalorder %s4396_s25, %s4396_s25 }
  0x34   : > { %p4204_p0 = scmp.lt.s32.totalorder %s4202_s29, %s4195_s22 }
  0x35   : > { %p4198_p7 = pnand %p4196_p5, %p4156_p13 }
  0x36   : > { %p4205_p2 = por %p4204_p0, %p4203_p12 }
  0x37   : > { %p4199_p9 = pneg %p4198_p7 }
  0x39   : > { %p4206_p1 = pnand %p4205_p2, %p4199_p9 }
  0x3b   : > { %4209 = shalt.err (!%p4206_p1)
}
  0x3c   : > { %3619 = dma.hbm_to_vmem [thread:$0]  (!%p4392_p11), %s4642_s2, 144, %s4396_s25, [#allocation6]  }
  0x3d   : > { %s4452_s5 = sadd.s32 1, %s4310_s15   ;;  %s27_s23 = sadd.s32 1, %s4306_s14 }
  0x3e   : > { %s24_s6 = ssub.s32 %s4310_s15, %s4452_s5  ;;  %p34_p13 = scmp.ne.s32.totalorder %s4306_s14, %s4302_s13 }
  0x3f   : > { %p25_p6 = scmp.eq.s32.totalorder %s24_s6, 0  ;;  %p35_p10 = scmp.eq.s32.totalorder %s4310_s15, 0 }
  0x40   : > { %p4651_p3 = scmp.eq.s32.totalorder %s4362_s16, 1  ;;  %p3630_p7 = scmp.lt.s32.totalorder %s4310_s15, 2 }
  0x41   : > { %s4468_s8 = scalar_select %p25_p6, %s4306_s14, %s27_s23  }
  0x42   : > { %p4462_p5 = por %p4651_p3, %p34_p13  ;;  %p36_p9 = por %p35_p10, %p34_p13 }
  0x43   : > { %s156_s9 = sand.u32 1, %s4306_s14   ;;  %s3597_s25 = smul.u32 640, %s4310_s15 }
  0x44   : > { %s4652_s7 = scalar_select %p4462_p5, 1, 0 }
  0x45   : > { %s3596_s10 = smul.u32 40, %s156_s9  ;;  %p4472_p11 = pnand %p3630_p7, %p36_p9 }
  0x46   : > { %s4479_s24 = scalar_lea.hbm %s4640_s0, %s3597_s25  ;;  %s157_s28 = scalar_lea.sflag [#allocation3], %s156_s9 }
  0x47   : > { %s160_s26 = scalar_lea.vmem [#allocation2], %s3596_s10  ;;  %s4210_s22 = scalar_lea.hbm %s4479_s24, 640 }
  0x48   : > { %s168_s27 = sshll.u32 %s160_s26, 4  ;;  %p4211_p12 = scmp.ne.s32.totalorder %s4479_s24, %s4210_s22  ;;  %s4481_s27 = int_to_ptr.vmem [resolvable:$true] %s168_s27 }
  0x49   : > { %p4212_p0 = pneg %p4472_p11  ;;  %s4215_s4 = scalar_lea.hbm %s4640_s0, 1280 }
  0x4a   : > { %p4216_p13 = scmp.lt.u32.totalorder %s4479_s24, %s4640_s0  ;;  %p4217_p6 = scmp.lt.u32.totalorder %s4215_s4, %s4210_s22 }
  0x4b   : > { %p4213_p2 = pnand %p4212_p0, %p4211_p12  ;;  %p4219_p3 = scmp.lt.u32.totalorder %s4210_s22, %s4479_s24 }
  0x4c   : > { %p4218_p10 = por %p4217_p6, %p4216_p13 }
  0x4d   : > { %p4214_p1 = pneg %p4213_p2 }
  0x4e   : > { %p4220_p7 = por %p4219_p3, %p4218_p10 }
  0x50   : > { %p4221_p9 = pnand %p4220_p7, %p4214_p1 }
  0x52   : > { %4224 = shalt.err (!%p4221_p9)
}
  0x53   : > { %s4225_s9 = scalar_lea.vmem %s4481_s27, 640  ;;  %s4316_s10 = smov [#allocation2]  }
  0x54   : > { %p4226_p12 = scmp.ne.s32.totalorder %s4481_s27, %s4225_s9  ;;  %s4230_s25 = sshll.u32 %s4316_s10, 4  ;;  %s4231_s25 = int_to_ptr.vmem [resolvable:$false] %s4230_s25 }
  0x55   : > { %s4232_s17 = scalar_lea.vmem %s4231_s25, 1280  ;;  %p4233_p4 = scmp.lt.s32.totalorder %s4481_s27, %s4231_s25 }
  0x56   : > { %p4228_p2 = pnand %p4226_p12, %p4212_p0  ;;  %p4234_p13 = scmp.lt.s32.totalorder %s4232_s17, %s4225_s9 }
  0x58   : > { %p4229_p5 = pneg %p4228_p2  ;;  %p4235_p6 = por %p4234_p13, %p4233_p4 }
  0x5a   : > { %p4236_p10 = pnand %p4235_p6, %p4229_p5 }
  0x5c   : > { %4239 = shalt.err (!%p4236_p10)
}
  0x5d   : > { %3623 = dma.hbm_to_vmem [thread:$0]  (!%p4472_p11), %s4479_s24, 640, %s4481_s27, %s157_s28  }
  0x5e   : > { %177 = sbr.rel (%p4381_p8) target bundleno = 684 (0x2ac), region = 32  ;;  %s4511_s21 = sand.u32 (!%p4381_p8), 1, %s4302_s13  }
  0x5f   : > { %s3598_s26 = smul.u32 (!%p4381_p8), 40, %s4511_s21  ;;  %s180_s22 = scalar_lea.sflag (!%p4381_p8), [#allocation3], %s4511_s21 }
  0x60   : > { %p4654_p4 = scmp.ne.s32.totalorder (!%p4381_p8), %s4647_s18, 0 }
  0x61   : > { %s4515_s29 = scalar_lea.vmem (!%p4381_p8), [#allocation2], %s3598_s26 }
  0x65   : > { %4285 = dma.done.wait (%p4654_p4), %s180_s22, 640  }
  0x66   : > { %4287 = vsyncadd (%p4654_p4), %s180_s22, 4294966656  ;;  %p4655_p5 = scmp.eq.s32.totalorder %s4362_s16, 0 }
  0x68   : > { %4289 = dma.done.wait (%p4655_p5), [#allocation6], 42768   ;;  %p4656_p8 = pmov %p4655_p5 }
  0x69   : > { %v3673_v0 = vld [vmem:[#allocation5 + $0x4] ss:$36 sps:$4 sm:$0xff]   ;;  %v3675_v1 = vld [vmem:[#allocation5 + $0xc] ss:$36 sps:$4 sm:$0xff]   ;;  %v3681_v5 = vld [vmem:[#allocation5 + $0x54] ss:$36 sps:$4 sm:$0xff]  }
  0x6a   : > { %4291 = vsyncadd (%p4656_p8), [#allocation6], 4294924528  ;;  %2369 = vmatprep.subr.bf16.mxu0 %v3673_v0  ;;  %v3677_v2 = vld [vmem:[#allocation5] ss:$36 sps:$4 sm:$0xff]   ;;  %v3678_v3 = vld [vmem:[#allocation5 + $0x8] ss:$36 sps:$4 sm:$0xff]   ;;  %2492 = vmatprep.subr.bf16.mxu1 %v3675_v1 }
  0x6b   : > { %v3679_v4 = vld [vmem:[#allocation5 + $0x4c] ss:$36 sps:$4 sm:$0xff]   ;;  %2370 = vmatpush1.bf16.msra.mxu0 %v3677_v2  ;;  %2493 = vmatpush1.bf16.msra.mxu1 %v3678_v3  ;;  %v3685_v8 = vld [vmem:[#allocation5 + $0x94] ss:$36 sps:$4 sm:$0xff]   ;;  %v3687_v9 = vld [vmem:[#allocation5 + $0x9c] ss:$36 sps:$4 sm:$0xff]  }
  0x6c   : > { %v3683_v6 = vld [vmem:[#allocation5 + $0x48] ss:$36 sps:$4 sm:$0xff]   ;;  %2371 = vmatprep.subr.bf16.mxu0 %v3679_v4  ;;  %v3684_v7 = vld [vmem:[#allocation5 + $0x50] ss:$36 sps:$4 sm:$0xff]   ;;  %2494 = vmatprep.subr.bf16.mxu1 %v3681_v5  ;;  %v3690_v11 = vld [vmem:[#allocation5 + $0x98] ss:$36 sps:$4 sm:$0xff]  }
  0x6d   : > { %v3689_v10 = vld [vmem:[#allocation5 + $0x90] ss:$36 sps:$4 sm:$0xff]   ;;  %v3691_v12 = vld [vmem:[#allocation5 + $0xdc] ss:$36 sps:$4 sm:$0xff]   ;;  %v3693_v13 = vld [vmem:[#allocation5 + $0xe4] ss:$36 sps:$4 sm:$0xff]  }
  0x6e   : > { %v3695_v14 = vld [vmem:[#allocation5 + $0xd8] ss:$36 sps:$4 sm:$0xff]   ;;  %v3696_v15 = vld [vmem:[#allocation5 + $0xe0] ss:$36 sps:$4 sm:$0xff]   ;;  %v3699_v17 = vld [vmem:[#allocation5 + $0x12c] ss:$36 sps:$4 sm:$0xff]  }
  0x6f   : > { %2372 = vmatpush1.bf16.msra.mxu0 %v3683_v6  ;;  %2495 = vmatpush1.bf16.msra.mxu1 %v3684_v7  ;;  %v3697_v16 = vld [vmem:[#allocation5 + $0x124] ss:$36 sps:$4 sm:$0xff]   ;;  %v3703_v20 = vld [vmem:[#allocation5 + $0x16c] ss:$36 sps:$4 sm:$0xff]   ;;  %v3705_v21 = vld [vmem:[#allocation5 + $0x174] ss:$36 sps:$4 sm:$0xff]  }
  0x70   : > { %2373 = vmatprep.subr.bf16.mxu0 %v3685_v8  ;;  %2496 = vmatprep.subr.bf16.mxu1 %v3687_v9  ;;  %v3701_v18 = vld [vmem:[#allocation5 + $0x120] ss:$36 sps:$4 sm:$0xff]   ;;  %v3702_v19 = vld [vmem:[#allocation5 + $0x128] ss:$36 sps:$4 sm:$0xff]   ;;  %v3708_v23 = vld [vmem:[#allocation5 + $0x170] ss:$36 sps:$4 sm:$0xff]  }
  0x71   : > { %v3707_v22 = vld [vmem:[#allocation5 + $0x168] ss:$36 sps:$4 sm:$0xff]   ;;  %v3709_v24 = vld [vmem:[#allocation5 + $0x1b4] ss:$36 sps:$4 sm:$0xff]   ;;  %v3711_v25 = vld [vmem:[#allocation5 + $0x1bc] ss:$36 sps:$4 sm:$0xff]  }
  0x72   : > { %v3713_v26 = vld [vmem:[#allocation5 + $0x1b0] ss:$36 sps:$4 sm:$0xff]   ;;  %v3714_v27 = vld [vmem:[#allocation5 + $0x1b8] ss:$36 sps:$4 sm:$0xff]   ;;  %v3717_v29 = vld [vmem:[#allocation5 + $0x204] ss:$36 sps:$4 sm:$0xff]  }
  0x73   : > { %2374 = vmatpush1.bf16.msra.mxu0 %v3689_v10  ;;  %2497 = vmatpush1.bf16.msra.mxu1 %v3690_v11  ;;  %v3715_v28 = vld [vmem:[#allocation5 + $0x1fc] ss:$36 sps:$4 sm:$0xff]   ;;  %v3721_v32 = vld [vmem:[#allocation5 + $0x244] ss:$36 sps:$4 sm:$0xff]   ;;  %v3723_v33 = vld [vmem:[#allocation5 + $0x24c] ss:$36 sps:$4 sm:$0xff]  }
  0x74   : > { %2375 = vmatprep.subr.bf16.mxu0 %v3691_v12  ;;  %2498 = vmatprep.subr.bf16.mxu1 %v3693_v13  ;;  %v3719_v30 = vld [vmem:[#allocation5 + $0x1f8] ss:$36 sps:$4 sm:$0xff]   ;;  %v3720_v31 = vld [vmem:[#allocation5 + $0x200] ss:$36 sps:$4 sm:$0xff]   ;;  %v3726_v35 = vld [vmem:[#allocation5 + $0x248] ss:$36 sps:$4 sm:$0xff]  }
  0x75   : > { %v3725_v34 = vld [vmem:[#allocation5 + $0x240] ss:$36 sps:$4 sm:$0xff]   ;;  %v3727_v36 = vld [vmem:[#allocation5 + $0x28c] ss:$36 sps:$4 sm:$0xff]   ;;  %v3729_v37 = vld [vmem:[#allocation5 + $0x294] ss:$36 sps:$4 sm:$0xff]  }
  0x76   : > { %v3731_v38 = vld [vmem:[#allocation5 + $0x288] ss:$36 sps:$4 sm:$0xff]   ;;  %v3732_v39 = vld [vmem:[#allocation5 + $0x290] ss:$36 sps:$4 sm:$0xff]   ;;  %v3735_v41 = vld [vmem:[#allocation5 + $0x2dc] ss:$36 sps:$4 sm:$0xff]  }
  0x77   : > { %2376 = vmatpush1.bf16.msra.mxu0 %v3695_v14  ;;  %2499 = vmatpush1.bf16.msra.mxu1 %v3696_v15  ;;  %v3733_v40 = vld [vmem:[#allocation5 + $0x2d4] ss:$36 sps:$4 sm:$0xff]   ;;  %v3739_v44 = vld [vmem:[#allocation5 + $0x31c] ss:$36 sps:$4 sm:$0xff]   ;;  %v3741_v45 = vld [vmem:[#allocation5 + $0x324] ss:$36 sps:$4 sm:$0xff]  }
  0x78   : > { %2377 = vmatprep.subr.bf16.mxu0 %v3697_v16  ;;  %2500 = vmatprep.subr.bf16.mxu1 %v3699_v17  ;;  %v3737_v42 = vld [vmem:[#allocation5 + $0x2d0] ss:$36 sps:$4 sm:$0xff]   ;;  %v3738_v43 = vld [vmem:[#allocation5 + $0x2d8] ss:$36 sps:$4 sm:$0xff]   ;;  %v3744_v49 = vld [vmem:[#allocation5 + $0x320] ss:$36 sps:$4 sm:$0xff]  }
  0x79   : > { %v216_v46 = vld [vmem:[%s4515_s29 + $0x8] sm:$0xff]  ;;  %v3747_v51 = vld [vmem:[#allocation5 + $0x36c] ss:$36 sps:$4 sm:$0xff]   ;;  %vm2341_vm0 = vcmask 1045504   ;;  %vm2337_vm1 = vcmask 621568   ;;  %vm4319_vm2 = vmmov 0  }
  0x7a   : > { %v3743_v47 = vld [vmem:[#allocation5 + $0x318] ss:$36 sps:$4 sm:$0xff]   ;;  %v4526_v48 = vpack.c.bf16 %v216_v46, %v216_v46  ;;  %v3745_v50 = vld [vmem:[#allocation5 + $0x364] ss:$36 sps:$4 sm:$0xff]   ;;  %v3751_v54 = vld [vmem:[#allocation5 + $0x3ac] ss:$36 sps:$4 sm:$0xff]  }
  0x7b   : > { %2378 = vmatpush1.bf16.msra.mxu0 %v3701_v18  ;;  %2501 = vmatpush1.bf16.msra.mxu1 %v3702_v19  ;;  %v3749_v52 = vld [vmem:[#allocation5 + $0x360] ss:$36 sps:$4 sm:$0xff]   ;;  %v3750_v53 = vld [vmem:[#allocation5 + $0x368] ss:$36 sps:$4 sm:$0xff]   ;;  %v3753_v55 = vld [vmem:[#allocation5 + $0x3b4] ss:$36 sps:$4 sm:$0xff]  }
  0x7c   : > { %2379 = vmatprep.subr.bf16.mxu0 %v3703_v20  ;;  %2502 = vmatprep.subr.bf16.mxu1 %v3705_v21  ;;  %v3755_v56 = vld [vmem:[#allocation5 + $0x3a8] ss:$36 sps:$4 sm:$0xff]   ;;  %v3756_v57 = vld [vmem:[#allocation5 + $0x3b0] ss:$36 sps:$4 sm:$0xff]   ;;  %v3759_v59 = vld [vmem:[#allocation5 + $0x3fc] ss:$36 sps:$4 sm:$0xff]  }
  0x7d   : > { %2401 = vmatprep.mubr.bf16.mxu0 %v4526_v48  ;;  %2524 = vmatprep.mubr.bf16.mxu1 %v4526_v48  ;;  %v3757_v58 = vld [vmem:[#allocation5 + $0x3f4] ss:$36 sps:$4 sm:$0xff]   ;;  %v3763_v62 = vld [vmem:[#allocation5 + $0x43c] ss:$36 sps:$4 sm:$0xff]   ;;  %v3765_v63 = vld [vmem:[#allocation5 + $0x444] ss:$36 sps:$4 sm:$0xff]  }
  0x7e   : > { %v3761_v60 = vld [vmem:[#allocation5 + $0x3f0] ss:$36 sps:$4 sm:$0xff]   ;;  %v3762_v61 = vld [vmem:[#allocation5 + $0x3f8] ss:$36 sps:$4 sm:$0xff]   ;;  %v3768_v1 = vld [vmem:[#allocation5 + $0x440] ss:$36 sps:$4 sm:$0xff]  }
  0x7f   : > { %2380 = vmatpush1.bf16.msra.mxu0 %v3707_v22  ;;  %2503 = vmatpush1.bf16.msra.mxu1 %v3708_v23  ;;  %v3767_v0 = vld [vmem:[#allocation5 + $0x438] ss:$36 sps:$4 sm:$0xff]   ;;  %v3771_v3 = vld [vmem:[#allocation5 + $0x484] ss:$36 sps:$4 sm:$0xff]   ;;  %v3774_v4 = vld [vmem:[#allocation5 + $0x48c] ss:$36 sps:$4 sm:$0xff]  }
  0x80   : > { %2381 = vmatprep.subr.bf16.mxu0 %v3709_v24  ;;  %2504 = vmatprep.subr.bf16.mxu1 %v3711_v25  ;;  %v215_v2 = vld [vmem:[%s4515_s29] sm:$0xff]  ;;  %v3769_v6 = vld [vmem:[#allocation5 + $0x480] ss:$36 sps:$4 sm:$0xff]   ;;  %v3772_v7 = vld [vmem:[#allocation5 + $0x488] ss:$36 sps:$4 sm:$0xff]   ;;  %s3599_s18 = smul.u32 36, %s4511_s21 }
  0x81   : > { %v4531_v5 = vpack.c.bf16 %v215_v2, %v215_v2  ;;  %v3777_v8 = vld [vmem:[#allocation5 + $0x4cc] ss:$36 sps:$4 sm:$0xff]   ;;  %v3780_v9 = vld [vmem:[#allocation5 + $0x4d4] ss:$36 sps:$4 sm:$0xff]   ;;  %v3786_v13 = vld [vmem:[#allocation5 + $0x51c] ss:$36 sps:$4 sm:$0xff]  }
  0x82   : > { %v3775_v10 = vld [vmem:[#allocation5 + $0x4c8] ss:$36 sps:$4 sm:$0xff]   ;;  %v3778_v11 = vld [vmem:[#allocation5 + $0x4d0] ss:$36 sps:$4 sm:$0xff]   ;;  %v3784_v15 = vld [vmem:[#allocation5 + $0x518] ss:$36 sps:$4 sm:$0xff]  }
  0x83   : > { %2382 = vmatpush1.bf16.msra.mxu0 %v3713_v26  ;;  %2505 = vmatpush1.bf16.msra.mxu1 %v3714_v27  ;;  %v3783_v12 = vld [vmem:[#allocation5 + $0x514] ss:$36 sps:$4 sm:$0xff]   ;;  %v3789_v16 = vld [vmem:[#allocation5 + $0x55c] ss:$36 sps:$4 sm:$0xff]   ;;  %v3792_v17 = vld [vmem:[#allocation5 + $0x564] ss:$36 sps:$4 sm:$0xff]  }
  0x84   : > { %2383 = vmatprep.subr.bf16.mxu0 %v3715_v28  ;;  %2506 = vmatprep.subr.bf16.mxu1 %v3717_v29  ;;  %v3781_v14 = vld [vmem:[#allocation5 + $0x510] ss:$36 sps:$4 sm:$0xff]   ;;  %v3787_v18 = vld [vmem:[#allocation5 + $0x558] ss:$36 sps:$4 sm:$0xff]   ;;  %v3790_v19 = vld [vmem:[#allocation5 + $0x560] ss:$36 sps:$4 sm:$0xff]  }
  0x85   : > { %v3795_v20 = vld [vmem:[#allocation5 + $0x5a4] ss:$36 sps:$4 sm:$0xff]   ;;  %v3798_v21 = vld [vmem:[#allocation5 + $0x5ac] ss:$36 sps:$4 sm:$0xff]   ;;  %v3804_v25 = vld [vmem:[#allocation5 + $0x5f4] ss:$36 sps:$4 sm:$0xff]  }
  0x86   : > { %v3793_v22 = vld [vmem:[#allocation5 + $0x5a0] ss:$36 sps:$4 sm:$0xff]   ;;  %v3796_v23 = vld [vmem:[#allocation5 + $0x5a8] ss:$36 sps:$4 sm:$0xff]   ;;  %v3802_v27 = vld [vmem:[#allocation5 + $0x5f0] ss:$36 sps:$4 sm:$0xff]  }
  0x87   : > { %2384 = vmatpush1.bf16.msra.mxu0 %v3719_v30  ;;  %2507 = vmatpush1.bf16.msra.mxu1 %v3720_v31  ;;  %v3801_v24 = vld [vmem:[#allocation5 + $0x5ec] ss:$36 sps:$4 sm:$0xff]   ;;  %v3807_v28 = vld [vmem:[#allocation5 + $0x634] ss:$36 sps:$4 sm:$0xff]   ;;  %v3810_v29 = vld [vmem:[#allocation5 + $0x63c] ss:$36 sps:$4 sm:$0xff]  }
  0x88   : > { %2385 = vmatprep.subr.bf16.mxu0 %v3721_v32  ;;  %2508 = vmatprep.subr.bf16.mxu1 %v3723_v33  ;;  %v3799_v26 = vld [vmem:[#allocation5 + $0x5e8] ss:$36 sps:$4 sm:$0xff]   ;;  %v3805_v31 = vld [vmem:[#allocation5 + $0x630] ss:$36 sps:$4 sm:$0xff]   ;;  %v3808_v33 = vld [vmem:[#allocation5 + $0x638] ss:$36 sps:$4 sm:$0xff]  }
  0x89   : > { %v218_v30 = vld [vmem:[%s4515_s29 + $0x18] sm:$0xff]  ;;  %v3856_v2 = vld [vmem:[#allocation5 + $0x878] ss:$36 sps:$4 sm:$0xff]   ;;  %s4584_s20 = scalar_lea.vmem [#allocation8], %s3599_s18  ;;  %s3600_s11 = smul.u32 576, %s4362_s16 }
  0x8a   : > { %v4536_v32 = vpack.c.bf16 %v218_v30, %v218_v30  ;;  %v3831_v46 = vld [vmem:[#allocation5 + $0x754] ss:$36 sps:$4 sm:$0xff]   ;;  %v3894_v30 = vld [vmem:[#allocation5 + $0xa28] ss:$36 sps:$4 sm:$0x3f]   ;;  %s3038_s24 = sshll.u32 %s4584_s20, 4  ;;  %s4597_s24 = int_to_ptr.vmem [resolvable:$true] %s3038_s24 }
  0x8b   : > { %2386 = vmatpush1.bf16.msra.mxu0 %v3725_v34  ;;  %2509 = vmatpush1.bf16.msra.mxu1 %v3726_v35  ;;  %v3813_v34 = vld [vmem:[#allocation5 + $0x67c] ss:$36 sps:$4 sm:$0xff]   ;;  %v3816_v35 = vld [vmem:[#allocation5 + $0x684] ss:$36 sps:$4 sm:$0xff]   ;;  %s4595_s30 = scalar_lea.hbm %s4643_s3, %s3600_s11  ;;  %s3024_s4 = scalar_lea.sflag [#allocation4], %s4511_s21 }
  0x8c   : > { %2387 = vmatprep.subr.bf16.mxu0 %v3727_v36  ;;  %2510 = vmatprep.subr.bf16.mxu1 %v3729_v37  ;;  %v3811_v36 = vld [vmem:[#allocation5 + $0x678] ss:$36 sps:$4 sm:$0xff]   ;;  %v3814_v37 = vld [vmem:[#allocation5 + $0x680] ss:$36 sps:$4 sm:$0xff]   ;;  %s4240_s16 = scalar_lea.vmem %s4597_s24, 576  ;;  %p4657_p0 = scmp.ne.s32.totalorder %s4652_s7, 0 }
  0x8d   : > { %p4241_p11 = scmp.ne.s32.totalorder %s4597_s24, %s4240_s16  ;;  %s4320_s23 = smov [#allocation8]  }
  0x8e   : > { %s4244_s6 = sshll.u32 %s4320_s23, 4  ;;  %s4245_s6 = int_to_ptr.vmem [resolvable:$false] %s4244_s6 }
  0x8f   : > { %2388 = vmatpush1.bf16.msra.mxu0 %v3731_v38  ;;  %2511 = vmatpush1.bf16.msra.mxu1 %v3732_v39  ;;  %v3819_v38 = vld [vmem:[#allocation5 + $0x6c4] ss:$36 sps:$4 sm:$0xff]   ;;  %v3822_v39 = vld [vmem:[#allocation5 + $0x6cc] ss:$36 sps:$4 sm:$0xff]   ;;  %p4242_p1 = pnand %p4241_p11, %p4657_p0  ;;  %s4246_s9 = scalar_lea.vmem %s4245_s6, 1152 }
  0x90   : > { %2389 = vmatprep.subr.bf16.mxu0 %v3733_v40  ;;  %2512 = vmatprep.subr.bf16.mxu1 %v3735_v41  ;;  %v3817_v40 = vld [vmem:[#allocation5 + $0x6c0] ss:$36 sps:$4 sm:$0xff]   ;;  %v3820_v41 = vld [vmem:[#allocation5 + $0x6c8] ss:$36 sps:$4 sm:$0xff]   ;;  %p4247_p7 = scmp.lt.s32.totalorder %s4597_s24, %s4245_s6  ;;  %p4248_p9 = scmp.lt.s32.totalorder %s4246_s9, %s4240_s16 }
  0x91   : > { %p4243_p3 = pneg %p4242_p1 }
  0x92   : > { %p4249_p12 = por %p4248_p9, %p4247_p7 }
  0x93   : > { %2390 = vmatpush1.bf16.msra.mxu0 %v3737_v42  ;;  %2513 = vmatpush1.bf16.msra.mxu1 %v3738_v43  ;;  %v3825_v42 = vld [vmem:[#allocation5 + $0x70c] ss:$36 sps:$4 sm:$0xff]   ;;  %v3828_v43 = vld [vmem:[#allocation5 + $0x714] ss:$36 sps:$4 sm:$0xff]  }
  0x94   : > { %2391 = vmatprep.subr.bf16.mxu0 %v3739_v44  ;;  %2514 = vmatprep.subr.bf16.mxu1 %v3741_v45  ;;  %v3823_v44 = vld [vmem:[#allocation5 + $0x708] ss:$36 sps:$4 sm:$0xff]   ;;  %v3826_v45 = vld [vmem:[#allocation5 + $0x710] ss:$36 sps:$4 sm:$0xff]   ;;  %p4250_p2 = pnand %p4249_p12, %p4243_p3 }
  0x97   : > { %2392 = vmatpush1.bf16.msra.mxu0 %v3743_v47  ;;  %2515 = vmatpush1.bf16.msra.mxu1 %v3744_v49  ;;  %v3834_v47 = vld [vmem:[#allocation5 + $0x75c] ss:$36 sps:$4 sm:$0xff]   ;;  %v3829_v49 = vld [vmem:[#allocation5 + $0x750] ss:$36 sps:$4 sm:$0xff]  }
  0x98   : > { %2393 = vmatprep.subr.bf16.mxu0 %v3745_v50  ;;  %2516 = vmatprep.subr.bf16.mxu1 %v3747_v51  ;;  %v3832_v50 = vld [vmem:[#allocation5 + $0x758] ss:$36 sps:$4 sm:$0xff]  }
  0x99   : > { %v3837_v51 = vld [vmem:[#allocation5 + $0x79c] ss:$36 sps:$4 sm:$0xff]  }
  0x9b   : > { %2394 = vmatpush1.bf16.msra.mxu0 %v3749_v52  ;;  %2517 = vmatpush1.bf16.msra.mxu1 %v3750_v53  ;;  %v3840_v52 = vld [vmem:[#allocation5 + $0x7a4] ss:$36 sps:$4 sm:$0xff]   ;;  %v3835_v53 = vld [vmem:[#allocation5 + $0x798] ss:$36 sps:$4 sm:$0xff]  }
  0x9c   : > { %2395 = vmatprep.subr.bf16.mxu0 %v3751_v54  ;;  %2518 = vmatprep.subr.bf16.mxu1 %v3753_v55  ;;  %v3838_v54 = vld [vmem:[#allocation5 + $0x7a0] ss:$36 sps:$4 sm:$0xff]  }
  0x9d   : > { %v3843_v55 = vld [vmem:[#allocation5 + $0x7e4] ss:$36 sps:$4 sm:$0xff]  }
  0x9f   : > { %2396 = vmatpush1.bf16.msra.mxu0 %v3755_v56  ;;  %2519 = vmatpush1.bf16.msra.mxu1 %v3756_v57  ;;  %v3846_v56 = vld [vmem:[#allocation5 + $0x7ec] ss:$36 sps:$4 sm:$0xff]   ;;  %v3841_v57 = vld [vmem:[#allocation5 + $0x7e0] ss:$36 sps:$4 sm:$0xff]  }
  0xa0   : > { %2397 = vmatprep.subr.bf16.mxu0 %v3757_v58  ;;  %2520 = vmatprep.subr.bf16.mxu1 %v3759_v59  ;;  %v3844_v58 = vld [vmem:[#allocation5 + $0x7e8] ss:$36 sps:$4 sm:$0xff]  }
  0xa1   : > { %v3849_v59 = vld [vmem:[#allocation5 + $0x82c] ss:$36 sps:$4 sm:$0xff]  }
  0xa3   : > { %2398 = vmatpush1.bf16.msra.mxu0 %v3761_v60  ;;  %2521 = vmatpush1.bf16.msra.mxu1 %v3762_v61  ;;  %v3852_v60 = vld [vmem:[#allocation5 + $0x834] ss:$36 sps:$4 sm:$0xff]   ;;  %v3847_v61 = vld [vmem:[#allocation5 + $0x828] ss:$36 sps:$4 sm:$0xff]  }
  0xa4   : > { %2399 = vmatprep.subr.bf16.mxu0 %v3763_v62  ;;  %2522 = vmatprep.subr.bf16.mxu1 %v3765_v63  ;;  %v3850_v62 = vld [vmem:[#allocation5 + $0x830] ss:$36 sps:$4 sm:$0xff]  }
  0xa5   : > { %v3855_v63 = vld [vmem:[#allocation5 + $0x874] ss:$36 sps:$4 sm:$0xff]  }
  0xa7   : > { %2400 = vmatpush1.bf16.msra.mxu0 %v3767_v0  ;;  %2523 = vmatpush1.bf16.msra.mxu1 %v3768_v1  ;;  %v3858_v0 = vld [vmem:[#allocation5 + $0x87c] ss:$36 sps:$4 sm:$0xff]   ;;  %v3853_v1 = vld [vmem:[#allocation5 + $0x870] ss:$36 sps:$4 sm:$0xff]  }
  0xa8   : > { %2410 = vmatprep.subr.bf16.mxu0 %v3771_v3  ;;  %2533 = vmatprep.subr.bf16.mxu1 %v3774_v4  ;;  %v3861_v3 = vld [vmem:[#allocation5 + $0x8bc] ss:$36 sps:$4 sm:$0xff]   ;;  %v3864_v4 = vld [vmem:[#allocation5 + $0x8c4] ss:$36 sps:$4 sm:$0xff]  }
  0xaa   : > { %2402 = vmatmul.mubr.bf16.vlgmr.msra.gmra.mrb[0].mxu0 %v4531_v5  ;;  %2525 = vmatmul.mubr.bf16.vlgmr.msra.gmra.mrb[0].mxu1 %v4531_v5 }
  0xab   : > { %2411 = vmatpush1.bf16.msra.mxu0 %v3769_v6  ;;  %2534 = vmatpush1.bf16.msra.mxu1 %v3772_v7  ;;  %v3859_v6 = vld [vmem:[#allocation5 + $0x8b8] ss:$36 sps:$4 sm:$0xff]   ;;  %v3862_v7 = vld [vmem:[#allocation5 + $0x8c0] ss:$36 sps:$4 sm:$0xff]  }
  0xac   : > { %2412 = vmatprep.subr.bf16.mxu0 %v3777_v8  ;;  %2535 = vmatprep.subr.bf16.mxu1 %v3780_v9  ;;  %v217_v8 = vld [vmem:[%s4515_s29 + $0x10] sm:$0xff] }
  0xad   : > { %2442 = vmatprep.mubr.bf16.mxu0 %v4536_v32  ;;  %2565 = vmatprep.mubr.bf16.mxu1 %v4536_v32  ;;  %v3867_v9 = vld [vmem:[#allocation5 + $0x904] ss:$36 sps:$4 sm:$0xff]  }
  0xaf   : > { %2413 = vmatpush1.bf16.msra.mxu0 %v3775_v10  ;;  %2536 = vmatpush1.bf16.msra.mxu1 %v3778_v11  ;;  %v3870_v10 = vld [vmem:[#allocation5 + $0x90c] ss:$36 sps:$4 sm:$0xff]   ;;  %v4541_v11 = vpack.c.bf16 %v217_v8, %v217_v8 }
  0xb0   : > { %2414 = vmatprep.subr.bf16.mxu0 %v3783_v12  ;;  %2537 = vmatprep.subr.bf16.mxu1 %v3786_v13  ;;  %v3865_v12 = vld [vmem:[#allocation5 + $0x900] ss:$36 sps:$4 sm:$0xff]   ;;  %v3868_v13 = vld [vmem:[#allocation5 + $0x908] ss:$36 sps:$4 sm:$0xff]   ;;  %v3943_v8 = vld [vmem:[#allocation5 + $0x250] ss:$36 sps:$4 sm:$0xff]  }
  0xb3   : > { %2415 = vmatpush1.bf16.msra.mxu0 %v3781_v14  ;;  %2538 = vmatpush1.bf16.msra.mxu1 %v3784_v15  ;;  %v3873_v14 = vld [vmem:[#allocation5 + $0x94c] ss:$36 sps:$4 sm:$0xff]   ;;  %v3876_v15 = vld [vmem:[#allocation5 + $0x954] ss:$36 sps:$4 sm:$0xff]  }
  0xb4   : > { %2416 = vmatprep.subr.bf16.mxu0 %v3789_v16  ;;  %2539 = vmatprep.subr.bf16.mxu1 %v3792_v17  ;;  %v3871_v16 = vld [vmem:[#allocation5 + $0x948] ss:$36 sps:$4 sm:$0xff]   ;;  %v3874_v17 = vld [vmem:[#allocation5 + $0x950] ss:$36 sps:$4 sm:$0xff]  }
  0xb7   : > { %2417 = vmatpush1.bf16.msra.mxu0 %v3787_v18  ;;  %2540 = vmatpush1.bf16.msra.mxu1 %v3790_v19  ;;  %v3879_v18 = vld [vmem:[#allocation5 + $0x994] ss:$36 sps:$4 sm:$0xff]   ;;  %v3882_v19 = vld [vmem:[#allocation5 + $0x99c] ss:$36 sps:$4 sm:$0xff]  }
  0xb8   : > { %2418 = vmatprep.subr.bf16.mxu0 %v3795_v20  ;;  %2541 = vmatprep.subr.bf16.mxu1 %v3798_v21  ;;  %v4317_v20 = vmov 0   ;;  %v3877_v21 = vld [vmem:[#allocation5 + $0x990] ss:$36 sps:$4 sm:$0xff]  }
  0xbb   : > { %2419 = vmatpush1.bf16.msra.mxu0 %v3793_v22  ;;  %2542 = vmatpush1.bf16.msra.mxu1 %v3796_v23  ;;  %v3880_v22 = vld [vmem:[#allocation5 + $0x998] ss:$36 sps:$4 sm:$0xff]  }
  0xbc   : > { %2420 = vmatprep.subr.bf16.mxu0 %v3801_v24  ;;  %2543 = vmatprep.subr.bf16.mxu1 %v3804_v25  ;;  %v3885_v23 = vld [vmem:[#allocation5 + $0x9dc] ss:$36 sps:$4 sm:$0xff]   ;;  %v3888_v24 = vld [vmem:[#allocation5 + $0x9e4] ss:$36 sps:$4 sm:$0xff]  }
  0xbd   : > { %v3883_v25 = vld [vmem:[#allocation5 + $0x9d8] ss:$36 sps:$4 sm:$0xff]  }
  0xbf   : > { %2421 = vmatpush1.bf16.msra.mxu0 %v3799_v26  ;;  %2544 = vmatpush1.bf16.msra.mxu1 %v3802_v27  ;;  %v3889_v26 = vld [vmem:[#allocation5 + $0xa24] ss:$36 sps:$4 sm:$0x3f]   ;;  %v3891_v27 = vld [vmem:[#allocation5 + $0xa2c] ss:$36 sps:$4 sm:$0x3f]  }
  0xc0   : > { %2422 = vmatprep.subr.bf16.mxu0 %v3807_v28  ;;  %2545 = vmatprep.subr.bf16.mxu1 %v3810_v29  ;;  %v3886_v28 = vld [vmem:[#allocation5 + $0x9e0] ss:$36 sps:$4 sm:$0xff]  }
  0xc1   : > { %v3893_v29 = vld [vmem:[#allocation5 + $0xa20] ss:$36 sps:$4 sm:$0x3f]  }
  0xc3   : > { %2423 = vmatpush1.bf16.msra.mxu0 %v3805_v31  ;;  %2546 = vmatpush1.bf16.msra.mxu1 %v3808_v33  ;;  %v2343_v31 = vsel %vm2341_vm0, %v3893_v29, 0  ;;  %v219_v33 = vld [vmem:[%s4515_s29 + $0x20] sm:$0xff]  ;;  %v3978_v29 = vld [vmem:[#allocation5 + $0x3c4] ss:$36 sps:$4 sm:$0xff]  }
  0xc4   : > { %2424 = vmatprep.subr.bf16.mxu0 %v3813_v34  ;;  %2547 = vmatprep.subr.bf16.mxu1 %v3816_v35  ;;  %v2349_v34 = vsel %vm2341_vm0, %v3894_v30, 0  ;;  %v3897_v35 = vld [vmem:[#allocation5 + $0x14] ss:$36 sps:$4 sm:$0xff]  }
  0xc5   : > { %v3973_v30 = vld [vmem:[#allocation5 + $0x3b8] ss:$36 sps:$4 sm:$0xff]  }
  0xc7   : > { %2425 = vmatpush1.bf16.msra.mxu0 %v3811_v36  ;;  %2548 = vmatpush1.bf16.msra.mxu1 %v3814_v37  ;;  %v3900_v36 = vld [vmem:[#allocation5 + $0x1c] ss:$36 sps:$4 sm:$0xff]   ;;  %v4552_v37 = vpack.c.bf16 %v219_v33, %v219_v33  ;;  %v3981_v33 = vld [vmem:[#allocation5 + $0x404] ss:$36 sps:$4 sm:$0xff]  }
  0xc8   : > { %2426 = vmatprep.subr.bf16.mxu0 %v3819_v38  ;;  %2549 = vmatprep.subr.bf16.mxu1 %v3822_v39  ;;  %v3895_v38 = vld [vmem:[#allocation5 + $0x10] ss:$36 sps:$4 sm:$0xff]   ;;  %v3898_v39 = vld [vmem:[#allocation5 + $0x18] ss:$36 sps:$4 sm:$0xff]  }
  0xcb   : > { %2427 = vmatpush1.bf16.msra.mxu0 %v3817_v40  ;;  %2550 = vmatpush1.bf16.msra.mxu1 %v3820_v41  ;;  %v3903_v40 = vld [vmem:[#allocation5 + $0x5c] ss:$36 sps:$4 sm:$0xff]   ;;  %v3906_v41 = vld [vmem:[#allocation5 + $0x64] ss:$36 sps:$4 sm:$0xff]  }
  0xcc   : > { %2428 = vmatprep.subr.bf16.mxu0 %v3825_v42  ;;  %2551 = vmatprep.subr.bf16.mxu1 %v3828_v43  ;;  %v3901_v42 = vld [vmem:[#allocation5 + $0x58] ss:$36 sps:$4 sm:$0xff]   ;;  %v3904_v43 = vld [vmem:[#allocation5 + $0x60] ss:$36 sps:$4 sm:$0xff]  }
  0xcf   : > { %2429 = vmatpush1.bf16.msra.mxu0 %v3823_v44  ;;  %2552 = vmatpush1.bf16.msra.mxu1 %v3826_v45  ;;  %v3909_v44 = vld [vmem:[#allocation5 + $0xa4] ss:$36 sps:$4 sm:$0xff]   ;;  %v3912_v45 = vld [vmem:[#allocation5 + $0xac] ss:$36 sps:$4 sm:$0xff]  }
  0xd0   : > { %2430 = vmatprep.subr.bf16.mxu0 %v3831_v46  ;;  %2553 = vmatprep.subr.bf16.mxu1 %v3834_v47  ;;  %v3907_v46 = vld [vmem:[#allocation5 + $0xa0] ss:$36 sps:$4 sm:$0xff]   ;;  %v3910_v47 = vld [vmem:[#allocation5 + $0xa8] ss:$36 sps:$4 sm:$0xff]  }
  0xd3   : > { %2431 = vmatpush1.bf16.msra.mxu0 %v3829_v49  ;;  %2554 = vmatpush1.bf16.msra.mxu1 %v3832_v50  ;;  %v3915_v49 = vld [vmem:[#allocation5 + $0xec] ss:$36 sps:$4 sm:$0xff]   ;;  %v3918_v50 = vld [vmem:[#allocation5 + $0xf4] ss:$36 sps:$4 sm:$0xff]  }
  0xd4   : > { %2432 = vmatprep.subr.bf16.mxu0 %v3837_v51  ;;  %2555 = vmatprep.subr.bf16.mxu1 %v3840_v52  ;;  %v3913_v51 = vld [vmem:[#allocation5 + $0xe8] ss:$36 sps:$4 sm:$0xff]   ;;  %v3916_v52 = vld [vmem:[#allocation5 + $0xf0] ss:$36 sps:$4 sm:$0xff]  }
  0xd7   : > { %2433 = vmatpush1.bf16.msra.mxu0 %v3835_v53  ;;  %2556 = vmatpush1.bf16.msra.mxu1 %v3838_v54  ;;  %v3921_v53 = vld [vmem:[#allocation5 + $0x134] ss:$36 sps:$4 sm:$0xff]   ;;  %v3924_v54 = vld [vmem:[#allocation5 + $0x13c] ss:$36 sps:$4 sm:$0xff]  }
  0xd8   : > { %2434 = vmatprep.subr.bf16.mxu0 %v3843_v55  ;;  %2557 = vmatprep.subr.bf16.mxu1 %v3846_v56  ;;  %v3919_v55 = vld [vmem:[#allocation5 + $0x130] ss:$36 sps:$4 sm:$0xff]   ;;  %v3922_v56 = vld [vmem:[#allocation5 + $0x138] ss:$36 sps:$4 sm:$0xff]  }
  0xdb   : > { %2435 = vmatpush1.bf16.msra.mxu0 %v3841_v57  ;;  %2558 = vmatpush1.bf16.msra.mxu1 %v3844_v58  ;;  %v3927_v57 = vld [vmem:[#allocation5 + $0x17c] ss:$36 sps:$4 sm:$0xff]   ;;  %v3930_v58 = vld [vmem:[#allocation5 + $0x184] ss:$36 sps:$4 sm:$0xff]  }
  0xdc   : > { %2436 = vmatprep.subr.bf16.mxu0 %v3849_v59  ;;  %2559 = vmatprep.subr.bf16.mxu1 %v3852_v60  ;;  %v3925_v59 = vld [vmem:[#allocation5 + $0x178] ss:$36 sps:$4 sm:$0xff]   ;;  %v3928_v60 = vld [vmem:[#allocation5 + $0x180] ss:$36 sps:$4 sm:$0xff]  }
  0xdf   : > { %2437 = vmatpush1.bf16.msra.mxu0 %v3847_v61  ;;  %2560 = vmatpush1.bf16.msra.mxu1 %v3850_v62  ;;  %v3933_v61 = vld [vmem:[#allocation5 + $0x1c4] ss:$36 sps:$4 sm:$0xff]   ;;  %v3936_v62 = vld [vmem:[#allocation5 + $0x1cc] ss:$36 sps:$4 sm:$0xff]  }
  0xe0   : > { %2438 = vmatprep.subr.bf16.mxu0 %v3855_v63  ;;  %2561 = vmatprep.subr.bf16.mxu1 %v3858_v0  ;;  %v3931_v63 = vld [vmem:[#allocation5 + $0x1c0] ss:$36 sps:$4 sm:$0xff]   ;;  %v3934_v0 = vld [vmem:[#allocation5 + $0x1c8] ss:$36 sps:$4 sm:$0xff]  }
  0xe3   : > { %2439 = vmatpush1.bf16.msra.mxu0 %v3853_v1  ;;  %2562 = vmatpush1.bf16.msra.mxu1 %v3856_v2  ;;  %v3939_v1 = vld [vmem:[#allocation5 + $0x20c] ss:$36 sps:$4 sm:$0xff]   ;;  %v3942_v2 = vld [vmem:[#allocation5 + $0x214] ss:$36 sps:$4 sm:$0xff]  }
  0xe4   : > { %2440 = vmatprep.subr.bf16.mxu0 %v3861_v3  ;;  %2563 = vmatprep.subr.bf16.mxu1 %v3864_v4  ;;  %v3937_v3 = vld [vmem:[#allocation5 + $0x208] ss:$36 sps:$4 sm:$0xff]   ;;  %v3940_v4 = vld [vmem:[#allocation5 + $0x210] ss:$36 sps:$4 sm:$0xff]  }
  0xe7   : > { %2441 = vmatpush1.bf16.msra.mxu0 %v3859_v6  ;;  %2564 = vmatpush1.bf16.msra.mxu1 %v3862_v7  ;;  %v3945_v6 = vld [vmem:[#allocation5 + $0x254] ss:$36 sps:$4 sm:$0xff]   ;;  %v3948_v7 = vld [vmem:[#allocation5 + $0x25c] ss:$36 sps:$4 sm:$0xff]  }
  0xe8   : > { %2451 = vmatprep.subr.bf16.mxu0 %v3867_v9  ;;  %2574 = vmatprep.subr.bf16.mxu1 %v3870_v10  ;;  %v3946_v9 = vld [vmem:[#allocation5 + $0x258] ss:$36 sps:$4 sm:$0xff]  }
  0xe9   : > { %v3951_v10 = vld [vmem:[#allocation5 + $0x29c] ss:$36 sps:$4 sm:$0xff]  }
  0xea   : > { %2443 = vmatmul.mubr.bf16.vlgmr.msra.gmra.mrb[0].mxu0 %v4541_v11  ;;  %2566 = vmatmul.mubr.bf16.vlgmr.msra.gmra.mrb[0].mxu1 %v4541_v11 }
  0xeb   : > { %2452 = vmatpush1.bf16.msra.mxu0 %v3865_v12  ;;  %2575 = vmatpush1.bf16.msra.mxu1 %v3868_v13  ;;  %v3954_v12 = vld [vmem:[#allocation5 + $0x2a4] ss:$36 sps:$4 sm:$0xff]   ;;  %v3949_v13 = vld [vmem:[#allocation5 + $0x298] ss:$36 sps:$4 sm:$0xff]  }
  0xec   : > { %2453 = vmatprep.subr.bf16.mxu0 %v3873_v14  ;;  %2576 = vmatprep.subr.bf16.mxu1 %v3876_v15  ;;  %v3952_v14 = vld [vmem:[#allocation5 + $0x2a0] ss:$36 sps:$4 sm:$0xff]  }
  0xed   : > { %2483 = vmatprep.mubr.bf16.mxu0 %v4317_v20  ;;  %2606 = vmatprep.mubr.bf16.mxu1 %v4317_v20  ;;  %v3957_v15 = vld [vmem:[#allocation5 + $0x2e4] ss:$36 sps:$4 sm:$0xff]  }
  0xef   : > { %2454 = vmatpush1.bf16.msra.mxu0 %v3871_v16  ;;  %2577 = vmatpush1.bf16.msra.mxu1 %v3874_v17  ;;  %v3960_v16 = vld [vmem:[#allocation5 + $0x2ec] ss:$36 sps:$4 sm:$0xff]   ;;  %v3955_v17 = vld [vmem:[#allocation5 + $0x2e0] ss:$36 sps:$4 sm:$0xff]  }
  0xf0   : > { %2455 = vmatprep.subr.bf16.mxu0 %v3879_v18  ;;  %2578 = vmatprep.subr.bf16.mxu1 %v3882_v19  ;;  %v3958_v18 = vld [vmem:[#allocation5 + $0x2e8] ss:$36 sps:$4 sm:$0xff]  }
  0xf1   : > { %v3963_v19 = vld [vmem:[#allocation5 + $0x32c] ss:$36 sps:$4 sm:$0xff]  }
  0xf3   : > { %2456 = vmatpush1.bf16.msra.mxu0 %v3877_v21  ;;  %2579 = vmatpush1.bf16.msra.mxu1 %v3880_v22  ;;  %v3966_v21 = vld [vmem:[#allocation5 + $0x334] ss:$36 sps:$4 sm:$0xff]   ;;  %v3961_v22 = vld [vmem:[#allocation5 + $0x328] ss:$36 sps:$4 sm:$0xff]  }
  0xf4   : > { %2457 = vmatprep.subr.bf16.mxu0 %v3885_v23  ;;  %2580 = vmatprep.subr.bf16.mxu1 %v3888_v24  ;;  %v3964_v23 = vld [vmem:[#allocation5 + $0x330] ss:$36 sps:$4 sm:$0xff]  }
  0xf5   : > { %v3969_v24 = vld [vmem:[#allocation5 + $0x374] ss:$36 sps:$4 sm:$0xff]  }
  0xf7   : > { %2458 = vmatpush1.bf16.msra.mxu0 %v3883_v25  ;;  %2581 = vmatpush1.bf16.msra.mxu1 %v3886_v28  ;;  %v3972_v25 = vld [vmem:[#allocation5 + $0x37c] ss:$36 sps:$4 sm:$0xff]  }
  0xf8   : > { %3470 = vmatprep.subr.msk.bf16.mxu0 %vm2341_vm0, %v3889_v26  ;;  %3472 = vmatprep.subr.msk.bf16.mxu1 %vm2341_vm0, %v3891_v27  ;;  %v3967_v26 = vld [vmem:[#allocation5 + $0x370] ss:$36 sps:$4 sm:$0xff]   ;;  %v3970_v27 = vld [vmem:[#allocation5 + $0x378] ss:$36 sps:$4 sm:$0xff]  }
  0xf9   : > { %v3975_v28 = vld [vmem:[#allocation5 + $0x3bc] ss:$36 sps:$4 sm:$0xff]  }
  0xfb   : > { %2460 = vmatpush1.bf16.msra.mxu0 %v2343_v31  ;;  %2583 = vmatpush1.bf16.msra.mxu1 %v2349_v34  ;;  %v3976_v31 = vld [vmem:[#allocation5 + $0x3c0] ss:$36 sps:$4 sm:$0xff]   ;;  %v3984_v34 = vld [vmem:[#allocation5 + $0x40c] ss:$36 sps:$4 sm:$0xff]  }
  0xfc   : > { %2615 = vmatprep.subr.bf16.mxu0 %v3897_v35  ;;  %2738 = vmatprep.subr.bf16.mxu1 %v3900_v36  ;;  %v3979_v35 = vld [vmem:[#allocation5 + $0x400] ss:$36 sps:$4 sm:$0xff]   ;;  %v3982_v36 = vld [vmem:[#allocation5 + $0x408] ss:$36 sps:$4 sm:$0xff]  }
  0xfe   : > { %3471 = vmatmul.mubr.msk.bf16.vlgmr.msra.gmra.mrb[0].mxu0 %vm2337_vm1, %v4552_v37  ;;  %3473 = vmatmul.mubr.msk.bf16.vlgmr.msra.gmra.mrb[0].mxu1 %vm2337_vm1, %v4552_v37 }
  0xff   : > { %2616 = vmatpush1.bf16.msra.mxu0 %v3895_v38  ;;  %2739 = vmatpush1.bf16.msra.mxu1 %v3898_v39  ;;  %v3987_v38 = vld [vmem:[#allocation5 + $0x44c] ss:$36 sps:$4 sm:$0xff]   ;;  %v3990_v39 = vld [vmem:[#allocation5 + $0x454] ss:$36 sps:$4 sm:$0xff]  }
 0x100   : > { %2617 = vmatprep.subr.bf16.mxu0 %v3903_v40  ;;  %2740 = vmatprep.subr.bf16.mxu1 %v3906_v41  ;;  %v3985_v40 = vld [vmem:[#allocation5 + $0x448] ss:$36 sps:$4 sm:$0xff]   ;;  %v3988_v41 = vld [vmem:[#allocation5 + $0x450] ss:$36 sps:$4 sm:$0xff]  }
 0x101   : > { %2647 = vmatprep.mubr.bf16.mxu0 %v4526_v48  ;;  %2770 = vmatprep.mubr.bf16.mxu1 %v4526_v48 }
 0x103   : > { %2618 = vmatpush1.bf16.msra.mxu0 %v3901_v42  ;;  %2741 = vmatpush1.bf16.msra.mxu1 %v3904_v43  ;;  %v3993_v42 = vld [vmem:[#allocation5 + $0x494] ss:$36 sps:$4 sm:$0xff]   ;;  %v3996_v43 = vld [vmem:[#allocation5 + $0x49c] ss:$36 sps:$4 sm:$0xff]  }
 0x104   : > { %2619 = vmatprep.subr.bf16.mxu0 %v3909_v44  ;;  %2742 = vmatprep.subr.bf16.mxu1 %v3912_v45  ;;  %v3991_v44 = vld [vmem:[#allocation5 + $0x490] ss:$36 sps:$4 sm:$0xff]   ;;  %v3994_v45 = vld [vmem:[#allocation5 + $0x498] ss:$36 sps:$4 sm:$0xff]  }
 0x107   : > { %2620 = vmatpush1.bf16.msra.mxu0 %v3907_v46  ;;  %2743 = vmatpush1.bf16.msra.mxu1 %v3910_v47  ;;  %v3999_v46 = vld [vmem:[#allocation5 + $0x4dc] ss:$36 sps:$4 sm:$0xff]   ;;  %v4002_v47 = vld [vmem:[#allocation5 + $0x4e4] ss:$36 sps:$4 sm:$0xff]  }
 0x108   : > { %2621 = vmatprep.subr.bf16.mxu0 %v3915_v49  ;;  %2744 = vmatprep.subr.bf16.mxu1 %v3918_v50  ;;  %v3997_v49 = vld [vmem:[#allocation5 + $0x4d8] ss:$36 sps:$4 sm:$0xff]   ;;  %v4000_v50 = vld [vmem:[#allocation5 + $0x4e0] ss:$36 sps:$4 sm:$0xff]  }
 0x10b   : > { %2622 = vmatpush1.bf16.msra.mxu0 %v3913_v51  ;;  %2745 = vmatpush1.bf16.msra.mxu1 %v3916_v52  ;;  %v4005_v51 = vld [vmem:[#allocation5 + $0x524] ss:$36 sps:$4 sm:$0xff]   ;;  %v4008_v52 = vld [vmem:[#allocation5 + $0x52c] ss:$36 sps:$4 sm:$0xff]  }
 0x10c   : > { %2623 = vmatprep.subr.bf16.mxu0 %v3921_v53  ;;  %2746 = vmatprep.subr.bf16.mxu1 %v3924_v54  ;;  %v4003_v53 = vld [vmem:[#allocation5 + $0x520] ss:$36 sps:$4 sm:$0xff]   ;;  %v4006_v54 = vld [vmem:[#allocation5 + $0x528] ss:$36 sps:$4 sm:$0xff]  }
 0x10f   : > { %2624 = vmatpush1.bf16.msra.mxu0 %v3919_v55  ;;  %2747 = vmatpush1.bf16.msra.mxu1 %v3922_v56  ;;  %v4011_v55 = vld [vmem:[#allocation5 + $0x56c] ss:$36 sps:$4 sm:$0xff]   ;;  %v4014_v56 = vld [vmem:[#allocation5 + $0x574] ss:$36 sps:$4 sm:$0xff]  }
 0x110   : > { %2625 = vmatprep.subr.bf16.mxu0 %v3927_v57  ;;  %2748 = vmatprep.subr.bf16.mxu1 %v3930_v58  ;;  %v4009_v57 = vld [vmem:[#allocation5 + $0x568] ss:$36 sps:$4 sm:$0xff]   ;;  %v4012_v58 = vld [vmem:[#allocation5 + $0x570] ss:$36 sps:$4 sm:$0xff]  }
 0x113   : > { %2626 = vmatpush1.bf16.msra.mxu0 %v3925_v59  ;;  %2749 = vmatpush1.bf16.msra.mxu1 %v3928_v60  ;;  %v4017_v59 = vld [vmem:[#allocation5 + $0x5b4] ss:$36 sps:$4 sm:$0xff]   ;;  %v4020_v60 = vld [vmem:[#allocation5 + $0x5bc] ss:$36 sps:$4 sm:$0xff]  }
 0x114   : > { %2627 = vmatprep.subr.bf16.mxu0 %v3933_v61  ;;  %2750 = vmatprep.subr.bf16.mxu1 %v3936_v62  ;;  %v4015_v61 = vld [vmem:[#allocation5 + $0x5b0] ss:$36 sps:$4 sm:$0xff]   ;;  %v4018_v62 = vld [vmem:[#allocation5 + $0x5b8] ss:$36 sps:$4 sm:$0xff]  }
 0x117   : > { %2628 = vmatpush1.bf16.msra.mxu0 %v3931_v63  ;;  %2751 = vmatpush1.bf16.msra.mxu1 %v3934_v0  ;;  %v4023_v63 = vld [vmem:[#allocation5 + $0x5fc] ss:$36 sps:$4 sm:$0xff]   ;;  %v4026_v0 = vld [vmem:[#allocation5 + $0x604] ss:$36 sps:$4 sm:$0xff]  }
 0x118   : > { %2629 = vmatprep.subr.bf16.mxu0 %v3939_v1  ;;  %2752 = vmatprep.subr.bf16.mxu1 %v3942_v2  ;;  %v4021_v1 = vld [vmem:[#allocation5 + $0x5f8] ss:$36 sps:$4 sm:$0xff]   ;;  %v4024_v2 = vld [vmem:[#allocation5 + $0x600] ss:$36 sps:$4 sm:$0xff]  }
 0x11b   : > { %2630 = vmatpush1.bf16.msra.mxu0 %v3937_v3  ;;  %2753 = vmatpush1.bf16.msra.mxu1 %v3940_v4  ;;  %v4029_v3 = vld [vmem:[#allocation5 + $0x644] ss:$36 sps:$4 sm:$0xff]   ;;  %v4032_v4 = vld [vmem:[#allocation5 + $0x64c] ss:$36 sps:$4 sm:$0xff]  }
 0x11c   : > { %2631 = vmatprep.subr.bf16.mxu0 %v3945_v6  ;;  %2754 = vmatprep.subr.bf16.mxu1 %v3948_v7  ;;  %v4027_v6 = vld [vmem:[#allocation5 + $0x640] ss:$36 sps:$4 sm:$0xff]   ;;  %v4030_v7 = vld [vmem:[#allocation5 + $0x648] ss:$36 sps:$4 sm:$0xff]  }
 0x11f   : > { %2632 = vmatpush1.bf16.msra.mxu0 %v3943_v8  ;;  %2755 = vmatpush1.bf16.msra.mxu1 %v3946_v9  ;;  %v4035_v8 = vld [vmem:[#allocation5 + $0x68c] ss:$36 sps:$4 sm:$0xff]   ;;  %v4038_v9 = vld [vmem:[#allocation5 + $0x694] ss:$36 sps:$4 sm:$0xff]  }
 0x120   : > { %2633 = vmatprep.subr.bf16.mxu0 %v3951_v10  ;;  %2756 = vmatprep.subr.bf16.mxu1 %v3954_v12  ;;  %v4033_v10 = vld [vmem:[#allocation5 + $0x688] ss:$36 sps:$4 sm:$0xff]   ;;  %v4036_v12 = vld [vmem:[#allocation5 + $0x690] ss:$36 sps:$4 sm:$0xff]  }
 0x123   : > { %2634 = vmatpush1.bf16.msra.mxu0 %v3949_v13  ;;  %2757 = vmatpush1.bf16.msra.mxu1 %v3952_v14  ;;  %v4041_v13 = vld [vmem:[#allocation5 + $0x6d4] ss:$36 sps:$4 sm:$0xff]   ;;  %v4044_v14 = vld [vmem:[#allocation5 + $0x6dc] ss:$36 sps:$4 sm:$0xff]  }
 0x124   : > { %2635 = vmatprep.subr.bf16.mxu0 %v3957_v15  ;;  %2758 = vmatprep.subr.bf16.mxu1 %v3960_v16  ;;  %v4039_v15 = vld [vmem:[#allocation5 + $0x6d0] ss:$36 sps:$4 sm:$0xff]   ;;  %v4042_v16 = vld [vmem:[#allocation5 + $0x6d8] ss:$36 sps:$4 sm:$0xff]  }
 0x127   : > { %2636 = vmatpush1.bf16.msra.mxu0 %v3955_v17  ;;  %2759 = vmatpush1.bf16.msra.mxu1 %v3958_v18  ;;  %v4047_v17 = vld [vmem:[#allocation5 + $0x71c] ss:$36 sps:$4 sm:$0xff]   ;;  %v4050_v18 = vld [vmem:[#allocation5 + $0x724] ss:$36 sps:$4 sm:$0xff]  }
 0x128   : > { %2637 = vmatprep.subr.bf16.mxu0 %v3963_v19  ;;  %2760 = vmatprep.subr.bf16.mxu1 %v3966_v21  ;;  %v4045_v19 = vld [vmem:[#allocation5 + $0x718] ss:$36 sps:$4 sm:$0xff]   ;;  %v4048_v21 = vld [vmem:[#allocation5 + $0x720] ss:$36 sps:$4 sm:$0xff]  }
 0x12b   : > { %2638 = vmatpush1.bf16.msra.mxu0 %v3961_v22  ;;  %2761 = vmatpush1.bf16.msra.mxu1 %v3964_v23  ;;  %v4053_v22 = vld [vmem:[#allocation5 + $0x764] ss:$36 sps:$4 sm:$0xff]   ;;  %v4056_v23 = vld [vmem:[#allocation5 + $0x76c] ss:$36 sps:$4 sm:$0xff]  }
 0x12c   : > { %2639 = vmatprep.subr.bf16.mxu0 %v3969_v24  ;;  %2762 = vmatprep.subr.bf16.mxu1 %v3972_v25  ;;  %v4051_v24 = vld [vmem:[#allocation5 + $0x760] ss:$36 sps:$4 sm:$0xff]   ;;  %v4054_v25 = vld [vmem:[#allocation5 + $0x768] ss:$36 sps:$4 sm:$0xff]  }
 0x12f   : > { %2640 = vmatpush1.bf16.msra.mxu0 %v3967_v26  ;;  %2763 = vmatpush1.bf16.msra.mxu1 %v3970_v27  ;;  %v4059_v26 = vld [vmem:[#allocation5 + $0x7ac] ss:$36 sps:$4 sm:$0xff]   ;;  %v4062_v27 = vld [vmem:[#allocation5 + $0x7b4] ss:$36 sps:$4 sm:$0xff]  }
 0x130   : > { %2641 = vmatprep.subr.bf16.mxu0 %v3975_v28  ;;  %2764 = vmatprep.subr.bf16.mxu1 %v3978_v29  ;;  %v4057_v28 = vld [vmem:[#allocation5 + $0x7a8] ss:$36 sps:$4 sm:$0xff]   ;;  %v4060_v29 = vld [vmem:[#allocation5 + $0x7b0] ss:$36 sps:$4 sm:$0xff]  }
 0x133   : > { %2642 = vmatpush1.bf16.msra.mxu0 %v3973_v30  ;;  %2765 = vmatpush1.bf16.msra.mxu1 %v3976_v31  ;;  %v4065_v30 = vld [vmem:[#allocation5 + $0x7f4] ss:$36 sps:$4 sm:$0xff]   ;;  %v4068_v31 = vld [vmem:[#allocation5 + $0x7fc] ss:$36 sps:$4 sm:$0xff]  }
 0x134   : > { %2643 = vmatprep.subr.bf16.mxu0 %v3981_v33  ;;  %2766 = vmatprep.subr.bf16.mxu1 %v3984_v34  ;;  %v4063_v33 = vld [vmem:[#allocation5 + $0x7f0] ss:$36 sps:$4 sm:$0xff]   ;;  %v4066_v34 = vld [vmem:[#allocation5 + $0x7f8] ss:$36 sps:$4 sm:$0xff]  }
 0x137   : > { %2644 = vmatpush1.bf16.msra.mxu0 %v3979_v35  ;;  %2767 = vmatpush1.bf16.msra.mxu1 %v3982_v36  ;;  %v4071_v35 = vld [vmem:[#allocation5 + $0x83c] ss:$36 sps:$4 sm:$0xff]   ;;  %v4074_v36 = vld [vmem:[#allocation5 + $0x844] ss:$36 sps:$4 sm:$0xff]  }
 0x138   : > { %2645 = vmatprep.subr.bf16.mxu0 %v3987_v38  ;;  %2768 = vmatprep.subr.bf16.mxu1 %v3990_v39  ;;  %v4069_v38 = vld [vmem:[#allocation5 + $0x838] ss:$36 sps:$4 sm:$0xff]   ;;  %v4072_v39 = vld [vmem:[#allocation5 + $0x840] ss:$36 sps:$4 sm:$0xff]  }
 0x13b   : > { %2646 = vmatpush1.bf16.msra.mxu0 %v3985_v40  ;;  %2769 = vmatpush1.bf16.msra.mxu1 %v3988_v41  ;;  %v4077_v40 = vld [vmem:[#allocation5 + $0x884] ss:$36 sps:$4 sm:$0xff]   ;;  %v4080_v41 = vld [vmem:[#allocation5 + $0x88c] ss:$36 sps:$4 sm:$0xff]  }
 0x13c   : > { %2656 = vmatprep.subr.bf16.mxu0 %v3993_v42  ;;  %2779 = vmatprep.subr.bf16.mxu1 %v3996_v43  ;;  %v4075_v42 = vld [vmem:[#allocation5 + $0x880] ss:$36 sps:$4 sm:$0xff]   ;;  %v4078_v43 = vld [vmem:[#allocation5 + $0x888] ss:$36 sps:$4 sm:$0xff]  }
 0x13e   : > { %2648 = vmatmul.mubr.bf16.vlgmr.msra.gmra.mrb[4].mxu0 %v4531_v5  ;;  %2771 = vmatmul.mubr.bf16.vlgmr.msra.gmra.mrb[4].mxu1 %v4531_v5 }
 0x13f   : > { %2657 = vmatpush1.bf16.msra.mxu0 %v3991_v44  ;;  %2780 = vmatpush1.bf16.msra.mxu1 %v3994_v45  ;;  %v4083_v44 = vld [vmem:[#allocation5 + $0x8cc] ss:$36 sps:$4 sm:$0xff]   ;;  %v4086_v45 = vld [vmem:[#allocation5 + $0x8d4] ss:$36 sps:$4 sm:$0xff]  }
 0x140   : > { %2658 = vmatprep.subr.bf16.mxu0 %v3999_v46  ;;  %2781 = vmatprep.subr.bf16.mxu1 %v4002_v47  ;;  %v4081_v46 = vld [vmem:[#allocation5 + $0x8c8] ss:$36 sps:$4 sm:$0xff]   ;;  %v4084_v47 = vld [vmem:[#allocation5 + $0x8d0] ss:$36 sps:$4 sm:$0xff]  }
 0x141   : > { %2688 = vmatprep.mubr.bf16.mxu0 %v4536_v32  ;;  %2811 = vmatprep.mubr.bf16.mxu1 %v4536_v32 }
 0x143   : > { %2659 = vmatpush1.bf16.msra.mxu0 %v3997_v49  ;;  %2782 = vmatpush1.bf16.msra.mxu1 %v4000_v50  ;;  %v4089_v49 = vld [vmem:[#allocation5 + $0x914] ss:$36 sps:$4 sm:$0xff]   ;;  %v4092_v50 = vld [vmem:[#allocation5 + $0x91c] ss:$36 sps:$4 sm:$0xff]  }
 0x144   : > { %2660 = vmatprep.subr.bf16.mxu0 %v4005_v51  ;;  %2783 = vmatprep.subr.bf16.mxu1 %v4008_v52  ;;  %v4087_v51 = vld [vmem:[#allocation5 + $0x910] ss:$36 sps:$4 sm:$0xff]   ;;  %v4090_v52 = vld [vmem:[#allocation5 + $0x918] ss:$36 sps:$4 sm:$0xff]  }
 0x147   : > { %2661 = vmatpush1.bf16.msra.mxu0 %v4003_v53  ;;  %2784 = vmatpush1.bf16.msra.mxu1 %v4006_v54  ;;  %v4095_v53 = vld [vmem:[#allocation5 + $0x95c] ss:$36 sps:$4 sm:$0xff]   ;;  %v4098_v54 = vld [vmem:[#allocation5 + $0x964] ss:$36 sps:$4 sm:$0xff]  }
 0x148   : > { %2662 = vmatprep.subr.bf16.mxu0 %v4011_v55  ;;  %2785 = vmatprep.subr.bf16.mxu1 %v4014_v56  ;;  %v4093_v55 = vld [vmem:[#allocation5 + $0x958] ss:$36 sps:$4 sm:$0xff]   ;;  %v4096_v56 = vld [vmem:[#allocation5 + $0x960] ss:$36 sps:$4 sm:$0xff]  }
 0x14b   : > { %2663 = vmatpush1.bf16.msra.mxu0 %v4009_v57  ;;  %2786 = vmatpush1.bf16.msra.mxu1 %v4012_v58  ;;  %v4101_v57 = vld [vmem:[#allocation5 + $0x9a4] ss:$36 sps:$4 sm:$0xff]   ;;  %v4104_v58 = vld [vmem:[#allocation5 + $0x9ac] ss:$36 sps:$4 sm:$0xff]  }
 0x14c   : > { %2664 = vmatprep.subr.bf16.mxu0 %v4017_v59  ;;  %2787 = vmatprep.subr.bf16.mxu1 %v4020_v60  ;;  %v4099_v59 = vld [vmem:[#allocation5 + $0x9a0] ss:$36 sps:$4 sm:$0xff]   ;;  %v4102_v60 = vld [vmem:[#allocation5 + $0x9a8] ss:$36 sps:$4 sm:$0xff]  }
 0x14f   : > { %2665 = vmatpush1.bf16.msra.mxu0 %v4015_v61  ;;  %2788 = vmatpush1.bf16.msra.mxu1 %v4018_v62  ;;  %v4107_v61 = vld [vmem:[#allocation5 + $0x9ec] ss:$36 sps:$4 sm:$0xff]   ;;  %v4110_v62 = vld [vmem:[#allocation5 + $0x9f4] ss:$36 sps:$4 sm:$0xff]  }
 0x150   : > { %2666 = vmatprep.subr.bf16.mxu0 %v4023_v63  ;;  %2789 = vmatprep.subr.bf16.mxu1 %v4026_v0  ;;  %v4105_v63 = vld [vmem:[#allocation5 + $0x9e8] ss:$36 sps:$4 sm:$0xff]   ;;  %v4108_v0 = vld [vmem:[#allocation5 + $0x9f0] ss:$36 sps:$4 sm:$0xff]  }
 0x153   : > { %2667 = vmatpush1.bf16.msra.mxu0 %v4021_v1  ;;  %2790 = vmatpush1.bf16.msra.mxu1 %v4024_v2  ;;  %v4111_v1 = vld [vmem:[#allocation5 + $0xa34] ss:$36 sps:$4 sm:$0x3f]   ;;  %v4113_v2 = vld [vmem:[#allocation5 + $0xa3c] ss:$36 sps:$4 sm:$0x3f]  }
 0x154   : > { %2668 = vmatprep.subr.bf16.mxu0 %v4029_v3  ;;  %2791 = vmatprep.subr.bf16.mxu1 %v4032_v4  ;;  %v4115_v3 = vld [vmem:[#allocation5 + $0xa30] ss:$36 sps:$4 sm:$0x3f]   ;;  %v4116_v4 = vld [vmem:[#allocation5 + $0xa38] ss:$36 sps:$4 sm:$0x3f]  }
 0x157   : > { %2669 = vmatpush1.bf16.msra.mxu0 %v4027_v6  ;;  %2792 = vmatpush1.bf16.msra.mxu1 %v4030_v7  ;;  %v2361_v6 = vsel %vm2341_vm0, %v4116_v4, 0  ;;  %v4117_v7 = vld [vmem:[#allocation5 + $0x260] ss:$36 sps:$4 sm:$0xff]  }
 0x158   : > { %2670 = vmatprep.subr.bf16.mxu0 %v4035_v8  ;;  %2793 = vmatprep.subr.bf16.mxu1 %v4038_v9  ;;  %v4119_v8 = vld [vmem:[#allocation5 + $0x6e0] ss:$36 sps:$4 sm:$0xff]  }
 0x159   : > { %v4118_v9 = vld [vmem:[#allocation5 + $0x20] ss:$36 sps:$4 sm:$0xff]  }
 0x15b   : > { %2671 = vmatpush1.bf16.msra.mxu0 %v4033_v10  ;;  %2794 = vmatpush1.bf16.msra.mxu1 %v4036_v12  ;;  %v4120_v10 = vld [vmem:[#allocation5 + $0x4a0] ss:$36 sps:$4 sm:$0xff]   ;;  %v4121_v12 = vld [vmem:[#allocation5 + $0x2a8] ss:$36 sps:$4 sm:$0xff]  }
 0x15c   : > { %2672 = vmatprep.subr.bf16.mxu0 %v4041_v13  ;;  %2795 = vmatprep.subr.bf16.mxu1 %v4044_v14  ;;  %v4123_v13 = vld [vmem:[#allocation5 + $0x728] ss:$36 sps:$4 sm:$0xff]  }
 0x15d   : > { %v4122_v14 = vld [vmem:[#allocation5 + $0x68] ss:$36 sps:$4 sm:$0xff]  }
 0x15f   : > { %2673 = vmatpush1.bf16.msra.mxu0 %v4039_v15  ;;  %2796 = vmatpush1.bf16.msra.mxu1 %v4042_v16  ;;  %v4124_v15 = vld [vmem:[#allocation5 + $0x4e8] ss:$36 sps:$4 sm:$0xff]   ;;  %v4125_v16 = vld [vmem:[#allocation5 + $0x2f0] ss:$36 sps:$4 sm:$0xff]  }
 0x160   : > { %2674 = vmatprep.subr.bf16.mxu0 %v4047_v17  ;;  %2797 = vmatprep.subr.bf16.mxu1 %v4050_v18  ;;  %v4127_v17 = vld [vmem:[#allocation5 + $0x770] ss:$36 sps:$4 sm:$0xff]  }
 0x161   : > { %v4126_v18 = vld [vmem:[#allocation5 + $0xb0] ss:$36 sps:$4 sm:$0xff]  }
 0x163   : > { %2675 = vmatpush1.bf16.msra.mxu0 %v4045_v19  ;;  %2798 = vmatpush1.bf16.msra.mxu1 %v4048_v21  ;;  %v4128_v19 = vld [vmem:[#allocation5 + $0x530] ss:$36 sps:$4 sm:$0xff]   ;;  %v4129_v21 = vld [vmem:[#allocation5 + $0x338] ss:$36 sps:$4 sm:$0xff]  }
 0x164   : > { %2676 = vmatprep.subr.bf16.mxu0 %v4053_v22  ;;  %2799 = vmatprep.subr.bf16.mxu1 %v4056_v23  ;;  %v4131_v22 = vld [vmem:[#allocation5 + $0x7b8] ss:$36 sps:$4 sm:$0xff]  }
 0x165   : > { %v4130_v23 = vld [vmem:[#allocation5 + $0xf8] ss:$36 sps:$4 sm:$0xff]  }
 0x167   : > { %2677 = vmatpush1.bf16.msra.mxu0 %v4051_v24  ;;  %2800 = vmatpush1.bf16.msra.mxu1 %v4054_v25  ;;  %v4132_v24 = vld [vmem:[#allocation5 + $0x578] ss:$36 sps:$4 sm:$0xff]   ;;  %v4133_v25 = vld [vmem:[#allocation5 + $0x380] ss:$36 sps:$4 sm:$0xff]  }
 0x168   : > { %2678 = vmatprep.subr.bf16.mxu0 %v4059_v26  ;;  %2801 = vmatprep.subr.bf16.mxu1 %v4062_v27  ;;  %v4135_v26 = vld [vmem:[#allocation5 + $0x800] ss:$36 sps:$4 sm:$0xff]   ;;  %v4137_v27 = vld [vmem:[#allocation5 + $0x3c8] ss:$36 sps:$4 sm:$0xff]  }
 0x16b   : > { %2679 = vmatpush1.bf16.msra.mxu0 %v4057_v28  ;;  %2802 = vmatpush1.bf16.msra.mxu1 %v4060_v29  ;;  %v4139_v28 = vld [vmem:[#allocation5 + $0x848] ss:$36 sps:$4 sm:$0xff]  }
 0x16c   : > { %2680 = vmatprep.subr.bf16.mxu0 %v4065_v30  ;;  %2803 = vmatprep.subr.bf16.mxu1 %v4068_v31  ;;  %v4138_v29 = vld [vmem:[#allocation5 + $0x188] ss:$36 sps:$4 sm:$0xff]   ;;  %v4141_v31 = vld [vmem:[#allocation5 + $0x410] ss:$36 sps:$4 sm:$0xff]  }
 0x16d   : > { %v4140_v30 = vld [vmem:[#allocation5 + $0x608] ss:$36 sps:$4 sm:$0xff]  }
 0x16f   : > { %2681 = vmatpush1.bf16.msra.mxu0 %v4063_v33  ;;  %2804 = vmatpush1.bf16.msra.mxu1 %v4066_v34  ;;  %v4143_v33 = vld [vmem:[#allocation5 + $0x890] ss:$36 sps:$4 sm:$0xff]  }
 0x170   : > { %2682 = vmatprep.subr.bf16.mxu0 %v4071_v35  ;;  %2805 = vmatprep.subr.bf16.mxu1 %v4074_v36  ;;  %v4142_v34 = vld [vmem:[#allocation5 + $0x1d0] ss:$36 sps:$4 sm:$0xff]   ;;  %v4145_v36 = vld [vmem:[#allocation5 + $0x458] ss:$36 sps:$4 sm:$0xff]  }
 0x171   : > { %v4144_v35 = vld [vmem:[#allocation5 + $0x650] ss:$36 sps:$4 sm:$0xff]  }
 0x173   : > { %2683 = vmatpush1.bf16.msra.mxu0 %v4069_v38  ;;  %2806 = vmatpush1.bf16.msra.mxu1 %v4072_v39  ;;  %v4147_v38 = vld [vmem:[#allocation5 + $0x8d8] ss:$36 sps:$4 sm:$0xff]  }
 0x174   : > { %2684 = vmatprep.subr.bf16.mxu0 %v4077_v40  ;;  %2807 = vmatprep.subr.bf16.mxu1 %v4080_v41  ;;  %v4146_v39 = vld [vmem:[#allocation5 + $0x218] ss:$36 sps:$4 sm:$0xff]   ;;  %v4149_v41 = vld [vmem:[#allocation5 + $0x920] ss:$36 sps:$4 sm:$0xff]  }
 0x175   : > { %v4148_v40 = vld [vmem:[#allocation5 + $0x698] ss:$36 sps:$4 sm:$0xff]  }
 0x177   : > { %2685 = vmatpush1.bf16.msra.mxu0 %v4075_v42  ;;  %2808 = vmatpush1.bf16.msra.mxu1 %v4078_v43  ;;  %v4318_v42 = vmov 0.0   ;;  %v4150_v43 = vld [vmem:[#allocation5 + $0x968] ss:$36 sps:$4 sm:$0xff]  }
 0x178   : > { %2686 = vmatprep.subr.bf16.mxu0 %v4083_v44  ;;  %2809 = vmatprep.subr.bf16.mxu1 %v4086_v45  ;;  %v4151_v44 = vld [vmem:[#allocation5 + $0x9b0] ss:$36 sps:$4 sm:$0xff]   ;;  %v4152_v45 = vld [vmem:[#allocation5 + $0x9f8] ss:$36 sps:$4 sm:$0xff]  }
 0x17b   : > { %2687 = vmatpush1.bf16.msra.mxu0 %v4081_v46  ;;  %2810 = vmatpush1.bf16.msra.mxu1 %v4084_v47  ;;  %v4153_v46 = vld [vmem:[#allocation5 + $0xa40] ss:$36 sps:$4 sm:$0x3f]  }
 0x17c   : > { %2697 = vmatprep.subr.bf16.mxu0 %v4089_v49  ;;  %2820 = vmatprep.subr.bf16.mxu1 %v4092_v50  ;;  %v2367_v47 = vsel %vm2341_vm0, %v4153_v46, 0 }
 0x17e   : > { %2689 = vmatmul.mubr.bf16.vlgmr.msra.gmra.mrb[4].mxu0 %v4541_v11  ;;  %2812 = vmatmul.mubr.bf16.vlgmr.msra.gmra.mrb[4].mxu1 %v4541_v11 }
 0x17f   : > { %2698 = vmatpush1.bf16.msra.mxu0 %v4087_v51  ;;  %2821 = vmatpush1.bf16.msra.mxu1 %v4090_v52  ;;  %v595_v51 = vld [vmem:[#allocation7] sm:$0xff] }
 0x180   : > { %2699 = vmatprep.subr.bf16.mxu0 %v4095_v53  ;;  %2822 = vmatprep.subr.bf16.mxu1 %v4098_v54 }
 0x181   : > { %2729 = vmatprep.mubr.bf16.mxu0 %v4317_v20  ;;  %2852 = vmatprep.mubr.bf16.mxu1 %v4317_v20  ;;  %v2355_v20 = vsel %vm2341_vm0, %v4115_v3, 0 }
 0x183   : > { %2700 = vmatpush1.bf16.msra.mxu0 %v4093_v55  ;;  %2823 = vmatpush1.bf16.msra.mxu1 %v4096_v56 }
 0x184   : > { %2701 = vmatprep.subr.bf16.mxu0 %v4101_v57  ;;  %2824 = vmatprep.subr.bf16.mxu1 %v4104_v58 }
 0x187   : > { %2702 = vmatpush1.bf16.msra.mxu0 %v4099_v59  ;;  %2825 = vmatpush1.bf16.msra.mxu1 %v4102_v60 }
 0x188   : > { %2703 = vmatprep.subr.bf16.mxu0 %v4107_v61  ;;  %2826 = vmatprep.subr.bf16.mxu1 %v4110_v62 }
 0x18b   : > { %2704 = vmatpush1.bf16.msra.mxu0 %v4105_v63  ;;  %2827 = vmatpush1.bf16.msra.mxu1 %v4108_v0 }
 0x18c   : > { %3474 = vmatprep.subr.msk.bf16.mxu0 %vm2341_vm0, %v4111_v1  ;;  %3476 = vmatprep.subr.msk.bf16.mxu1 %vm2341_vm0, %v4113_v2 }
 0x18f   : > { %2706 = vmatpush1.bf16.msra.mxu0 %v2355_v20  ;;  %2829 = vmatpush1.bf16.msra.mxu1 %v2361_v6 }
 0x190   : > { %3492 = vmatprep.subr.bf16.mxu0 %v4117_v7  ;;  %3514 = vmatprep.subr.bf16.mxu1 %v4119_v8 }
 0x192   : > { %3475 = vmatmul.mubr.msk.bf16.vlgmr.msra.gmra.mrb[4].mxu0 %vm2337_vm1, %v4552_v37  ;;  %3477 = vmatmul.mubr.msk.bf16.vlgmr.msra.gmra.mrb[4].mxu1 %vm2337_vm1, %v4552_v37 }
 0x193   : > { %3493 = vmatpush3.bf16.msra.mxu0 %v4118_v9  ;;  %3515 = vmatpush3.bf16.msra.mxu1 %v4120_v10 }
 0x194   : > { %3494 = vmatprep.subr.bf16.mxu0 %v4121_v12  ;;  %3516 = vmatprep.subr.bf16.mxu1 %v4123_v13 }
 0x195   : > { %2893 = vmatprep.mubr.bf16.mxu0 %v4526_v48  ;;  %2933 = vmatprep.mubr.bf16.mxu1 %v4536_v32  ;;  %v4134_v48 = vld [vmem:[#allocation5 + $0x140] ss:$36 sps:$4 sm:$0xff]  }
 0x196   : > { %v4136_v32 = vld [vmem:[#allocation5 + $0x5c0] ss:$36 sps:$4 sm:$0xff]  }
 0x197   : > { %3495 = vmatpush3.bf16.msra.mxu0 %v4122_v14  ;;  %3517 = vmatpush3.bf16.msra.mxu1 %v4124_v15 }
 0x198   : > { %3496 = vmatprep.subr.bf16.mxu0 %v4125_v16  ;;  %3518 = vmatprep.subr.bf16.mxu1 %v4127_v17 }
 0x19b   : > { %3497 = vmatpush3.bf16.msra.mxu0 %v4126_v18  ;;  %3519 = vmatpush3.bf16.msra.mxu1 %v4128_v19 }
 0x19c   : > { %3498 = vmatprep.subr.bf16.mxu0 %v4129_v21  ;;  %3520 = vmatprep.subr.bf16.mxu1 %v4131_v22 }
 0x19f   : > { %3499 = vmatpush3.bf16.msra.mxu0 %v4130_v23  ;;  %3521 = vmatpush3.bf16.msra.mxu1 %v4132_v24 }
 0x1a0   : > { %3500 = vmatprep.subr.bf16.mxu0 %v4133_v25  ;;  %3522 = vmatprep.subr.bf16.mxu1 %v4135_v26 }
 0x1a3   : > { %3501 = vmatpush3.bf16.msra.mxu0 %v4134_v48  ;;  %3523 = vmatpush3.bf16.msra.mxu1 %v4136_v32 }
 0x1a4   : > { %3502 = vmatprep.subr.bf16.mxu0 %v4137_v27  ;;  %3524 = vmatprep.subr.bf16.mxu1 %v4139_v28 }
 0x1a7   : > { %3503 = vmatpush3.bf16.msra.mxu0 %v4138_v29  ;;  %3525 = vmatpush3.bf16.msra.mxu1 %v4140_v30 }
 0x1a8   : > { %3504 = vmatprep.subr.bf16.mxu0 %v4141_v31  ;;  %3526 = vmatprep.subr.bf16.mxu1 %v4143_v33  ;;  %v3136_v31 = vld [vmem:[#allocation7 + $0x8] ss:$0 sm:$0xff] }
 0x1ab   : > { %3505 = vmatpush3.bf16.msra.mxu0 %v4142_v34  ;;  %3527 = vmatpush3.bf16.msra.mxu1 %v4144_v35 }
 0x1ac   : > { %3506 = vmatprep.subr.bf16.mxu0 %v4145_v36  ;;  %3528 = vmatprep.subr.bf16.mxu1 %v4147_v38 }
 0x1af   : > { %3507 = vmatpush3.bf16.msra.mxu0 %v4146_v39  ;;  %3529 = vmatpush3.bf16.msra.mxu1 %v4148_v40 }
 0x1b0   : > { %3542 = vmatprep.subr.bf16.mxu0 %v4318_v42 }
 0x1b2   : > { %2894 = vmatmul.mubr.bf16.vlgmr.msra.gmra.mrb[8].mxu0 %v4531_v5  ;;  %2934 = vmatmul.mubr.bf16.vlgmr.msra.gmra.mrb[8].mxu1 %v4541_v11  ;;  %v599_v5 = vlaneseq }
 0x1b3   : > { %3543 = vmatpush3.bf16.msra.mxu0 %v4149_v41  ;;  %3552 = vmatprep.mubr.msk.bf16.mxu0 %vm4319_vm2, %v4318_v42 }
 0x1b4   : > { %3544 = vmatprep.subr.bf16.mxu0 %v4318_v42  ;;  %v600_v11 = vshrl.u32 %v599_v5, 7 }
 0x1b6   : > { %v601_v49 = vsub.s32 0, %v600_v11  ;;  %v609_v50 = vsub.s32 2, %v600_v11  ;;  %v605_v52 = vsub.s32 1, %v600_v11  ;;  %v613_v53 = vsub.s32 3, %v600_v11 }
 0x1b7   : > { %3545 = vmatpush3.bf16.msra.mxu0 %v4150_v43  ;;  %v617_v7 = vsub.s32 4, %v600_v11  ;;  %v625_v8 = vsub.s32 6, %v600_v11  ;;  %v621_v9 = vsub.s32 5, %v600_v11  ;;  %v629_v10 = vsub.s32 7, %v600_v11 }
 0x1b8   : > { %3546 = vmatprep.subr.bf16.mxu0 %v4318_v42  ;;  %v602_v54 = vrot.slane %v595_v51, %v601_v49  ;;  %v610_v55 = vrot.slane %v595_v51, %v609_v50  ;;  %v606_v56 = vrot.slane %v595_v51, %v605_v52  ;;  %v614_v57 = vrot.slane %v595_v51, %v613_v53 }
 0x1b9   : > { %v618_v12 = vrot.slane %v595_v51, %v617_v7  ;;  %v626_v13 = vrot.slane %v595_v51, %v625_v8  ;;  %v622_v14 = vrot.slane %v595_v51, %v621_v9  ;;  %v630_v15 = vrot.slane %v595_v51, %v629_v10 }
 0x1bb   : > { %3547 = vmatpush3.bf16.msra.mxu0 %v4151_v44 }
 0x1bc   : > { %3548 = vmatprep.subr.bf16.mxu0 %v4318_v42 }
 0x1bf   : > { %3549 = vmatpush3.bf16.msra.mxu0 %v4152_v45 }
 0x1c0   : > { %3550 = vmatprep.subr.bf16.mxu0 %v4318_v42 }
 0x1c3   : > { %3551 = vmatpush3.bf16.msra.mxu0 %v2367_v47 }
 0x1c6   : > { %3553 = vmatmul.mubr.msk.bf16.vlgmr.msra.gmra.mrb[12].mxu0 %vm2337_vm1, %v4552_v37 }
 0x1d1   : > { %v2485_v58 = vpop.f32.mrb[0].mxu0  ;;  %v2608_v59 = vpop.f32.mrb[0].mxu1 }
 0x1d2   : > { %v3556_v60 = vadd.f32 %v2485_v58, %v602_v54  ;;  %v3558_v61 = vadd.f32 %v2608_v59, %v610_v55  ;;  %v2487_v62 = vpop.f32.mrb[1].mxu0  ;;  %v2610_v63 = vpop.f32.mrb[1].mxu1 }
 0x1d3   : > { %v3557_v0 = vadd.f32 %v2487_v62, %v606_v56  ;;  %v3559_v1 = vadd.f32 %v2610_v63, %v614_v57  ;;  %v2489_v37 = vpop.f32.mrb[2].mxu0  ;;  %v2612_v2 = vpop.f32.mrb[2].mxu1 }
 0x1d4   : > { %v2490_v3 = vpop.f32.mrb[3].mxu0  ;;  %v2613_v4 = vpop.f32.mrb[3].mxu1 }
 0x1d5   : > { %v3487_v20 = vpack.c.bf16 %v3557_v0, %v3556_v60  ;;  %v3488_v6 = vpack.c.bf16 %v3559_v1, %v3558_v61 }
 0x1d7   : > { %3018 = vst [vmem:[%s4584_s20] sm:$0xff] %v3487_v20  ;;  %3019 = vst [vmem:[%s4584_s20 + $0x8] sm:$0xff] %v3488_v6 }
 0x265   : > { %v2731_v16 = vpop.f32.mrb[4].mxu0  ;;  %v2854_v17 = vpop.f32.mrb[4].mxu1 }
 0x266   : > { %v3560_v18 = vadd.f32 %v2731_v16, %v618_v12  ;;  %v3562_v19 = vadd.f32 %v2854_v17, %v626_v13  ;;  %v2733_v21 = vpop.f32.mrb[5].mxu0  ;;  %v2856_v22 = vpop.f32.mrb[5].mxu1 }
 0x267   : > { %v3561_v23 = vadd.f32 %v2733_v21, %v622_v14  ;;  %v3563_v24 = vadd.f32 %v2856_v22, %v630_v15  ;;  %v2735_v25 = vpop.f32.mrb[6].mxu0  ;;  %v2858_v26 = vpop.f32.mrb[6].mxu1 }
 0x268   : > { %v2736_v48 = vpop.f32.mrb[7].mxu0  ;;  %v2859_v32 = vpop.f32.mrb[7].mxu1 }
 0x269   : > { %v3489_v27 = vpack.c.bf16 %v3561_v23, %v3560_v18  ;;  %v3490_v28 = vpack.c.bf16 %v3563_v24, %v3562_v19 }
 0x26b   : > { %3020 = vst [vmem:[%s4584_s20 + $0x10] sm:$0xff] %v3489_v27  ;;  %3021 = vst [vmem:[%s4584_s20 + $0x18] sm:$0xff] %v3490_v28 }
 0x285   : > { %v3508_v29 = vpop.f32.mrb[8].mxu0  ;;  %v3530_v30 = vpop.f32.mrb[8].mxu1 }
 0x286   : > { %v3509_v33 = vpop.f32.mrb[9].mxu0  ;;  %v3531_v34 = vpop.f32.mrb[9].mxu1 }
 0x287   : > { %v3510_v35 = vadd.f32 %v3509_v33, %v3508_v29  ;;  %v3511_v36 = vpop.f32.mrb[10].mxu0  ;;  %v3532_v38 = vadd.f32 %v3531_v34, %v3530_v30  ;;  %v3533_v39 = vpop.f32.mrb[10].mxu1 }
 0x288   : > { %v3512_v40 = vpop.f32.mrb[11].mxu0  ;;  %v3534_v41 = vpop.f32.mrb[11].mxu1 }
 0x289   : > { %v2896_v42 = vadd.f32 %v3510_v35, %v3136_v31 }
 0x28b   : > { %v2936_v43 = vadd.f32 %v3532_v38, %v2896_v42 }
 0x299   : > { %v2975_v44 = vpop.f32.mrb[12].mxu0 }
 0x29a   : > { %v2976_v45 = vadd.f32 %v2975_v44, %v2936_v43  ;;  %v3554_v46 = vpop.f32.mrb[13].mxu0 }
 0x29b   : > { %v2978_v47 = vpop.f32.mrb[14].mxu0 }
 0x29c   : > { %v3491_v5 = vpack.c.bf16 %v2976_v45, %v2976_v45  ;;  %v3555_v11 = vpop.f32.mrb[15].mxu0 }
 0x29e   : > { %3022 = vst [vmem:[%s4584_s20 + $0x20] sm:$0xf] %v3491_v5 }
 0x29f   : > { %4253 = shalt.err (!%p4250_p2)
}
 0x2a0   : > { %s4254_s10 = scalar_lea.hbm %s4595_s30, 576  ;;  %s4258_s21 = scalar_lea.hbm %s4643_s3, 1152 }
 0x2a1   : > { %p4255_p13 = scmp.ne.s32.totalorder %s4595_s30, %s4254_s10  ;;  %p4259_p4 = scmp.lt.u32.totalorder %s4595_s30, %s4643_s3 }
 0x2a2   : > { %p4260_p5 = scmp.lt.u32.totalorder %s4258_s21, %s4254_s10  ;;  %p4262_p11 = scmp.lt.u32.totalorder %s4254_s10, %s4595_s30 }
 0x2a3   : > { %p4256_p6 = pnand %p4255_p13, %p4657_p0 }
 0x2a4   : > { %p4261_p8 = por %p4260_p5, %p4259_p4 }
 0x2a5   : > { %p4257_p10 = pneg %p4256_p6 }
 0x2a6   : > { %p4263_p1 = por %p4262_p11, %p4261_p8 }
 0x2a8   : > { %p4264_p3 = pnand %p4263_p1, %p4257_p10 }
 0x2aa   : > { %4267 = shalt.err (!%p4264_p3)
}
 0x2ab   : > { %3611 = dma.vmem_to_hbm [thread:$0]  (%p4657_p0), %s4597_s24, 576, %s4595_s30, %s3024_s4  }
 0x2ac PF: > { %s3050_s29 = sand.u32 1, %s4298_s12   ;;  %p4658_p7 = scmp.ne.s32.totalorder %s4648_s19, 0 }
 0x2ad   : > { %p4659_p9 = scmp.ge.s32.totalorder %s4310_s15, 2  ;;  %s3051_s18 = scalar_lea.sflag [#allocation4], %s3050_s29 }
 0x2af   : > { %p3625_p12 = pnand %p4659_p9, %p4658_p7 }
 0x2b1   : > { %4293 = dma.done.wait (!%p3625_p12), %s3051_s18, 576  }
 0x2b2   : > { %4295 = vsyncadd (!%p3625_p12), %s3051_s18, 4294966720  ;;  %p17_p2 = scmp.ge.s32.totalorder %s4452_s5, 4   ;;  %s4660_s12 = smov %s4302_s13 }
 0x2b3   : > { %s4661_s13 = smov %s4306_s14  ;;  %s4662_s14 = smov %s4468_s8 }
 0x2b4   : > { %s4663_s15 = smov %s4452_s5  ;;  %19 = sbr.rel (!%p17_p2) target bundleno = 6 (0x6), region = 85 }
 0x2bb   :  { %3056 = vsyncpa [#allocation3], 1 }
 0x2bc   :  { %3058 = vsyncpa [#allocation3 + $0x1], 1 }
 0x2bd   :  { %3059 = vsyncpa [#allocation6], 1 }
 0x2be   :  { %3060 = vsyncpa [#allocation4], 1 }
 0x2bf   :  { %3062 = vsyncpa [#allocation4 + $0x1], 1 }

</bundles_post_ra>
